<compile_context>
chip_gen: v7x
topology: tpu7x:2x2x1
jax: 0.10.0
libtpu: 0.0.40
codegen_flags: <defaults>
</compile_context>

<pallas_src>
import functools

import jax
import jax.numpy as jnp
import numpy as np
from jax import lax
from jax.experimental import pallas as pl
from jax.experimental.pallas import tpu as pltpu


def _round_up(x, m):
    return (x + m - 1) // m * m


def _lstm_rec_kernel(xw_ref, wh_ref, lens_ref, h0_ref, c0_ref,
                     out_ref, hf_ref, cf_ref, *, t_block, hidden_pad):
    """Recurrent stage; grid axis iterates time blocks sequentially.

    xw_ref  : (Tb, Bp, 4*Hp)  precomputed x @ Wx + bias (gate-aligned columns)
    wh_ref  : (Hp, 4*Hp)      recurrent weights (gate-aligned columns)
    lens_ref: (Bp, 1)         int32 sequence lengths
    h0/c0   : (Bp, Hp)        initial state
    out_ref : (Tb, Bp, Hp)    per-step hidden outputs (zeros past each seq end)
    hf/cf   : (Bp, Hp)        resident final-state accumulators across the grid
    """
    Hp = hidden_pad
    blk = pl.program_id(0)

    @pl.when(blk == 0)
    def _():
        hf_ref[...] = h0_ref[...]
        cf_ref[...] = c0_ref[...]

    wh = wh_ref[...]                        # (Hp, 4Hp)
    lens = lens_ref[...]                    # (Bp, 1) int32
    t0 = blk * t_block

    def step(j, carry):
        h, c = carry
        t = t0 + j
        # Only the recurrent matmul sits on the sequential critical path.
        gates = xw_ref[j] + jnp.dot(h, wh, preferred_element_type=jnp.float32)
        i_g = jax.nn.sigmoid(gates[:, 0 * Hp:1 * Hp])   # lane-aligned slices
        f_g = jax.nn.sigmoid(gates[:, 1 * Hp:2 * Hp])
        g_g = jnp.tanh(gates[:, 2 * Hp:3 * Hp])
        o_g = jax.nn.sigmoid(gates[:, 3 * Hp:4 * Hp])
        c_new = f_g * c + i_g * g_g
        h_new = o_g * jnp.tanh(c_new)
        mask = lens > t                                  # packed-seq freeze
        h_u = jnp.where(mask, h_new, h)
        c_u = jnp.where(mask, c_new, c)
        out_ref[j] = jnp.where(mask, h_new, 0.0)         # padded steps -> 0
        return h_u, c_u

    h_fin, c_fin = lax.fori_loop(0, t_block, step,
                                 (hf_ref[...], cf_ref[...]), unroll=True)
    hf_ref[...] = h_fin
    cf_ref[...] = c_fin


def lstm_forward(x, lens, hidden, params, *, t_block=16):
    """x: (B, T, I); lens: (B,) int, descending; hidden: (h0, c0) each (1, B, H)."""
    w_ih, w_hh, b_ih, b_hh = params          # (4H, I), (4H, H), (4H,), (4H,)
    B, T, I = x.shape
    H = w_hh.shape[1]
    f32 = jnp.float32

    Hp = _round_up(H, 128)                   # lane-aligned gate width
    Bp = _round_up(B, 8)                     # full sublane tiles
    Tb = min(t_block, _round_up(T, 8))       # time steps per grid block
    Tp = _round_up(T, Tb)

    wx_t = jnp.transpose(w_ih).astype(f32)   # (I, 4H)
    wh_t = jnp.transpose(w_hh).astype(f32)   # (H, 4H)
    bias = (b_ih + b_hh).astype(f32)         # (4H,)

    # Repack so gate g occupies columns [g*Hp, g*Hp + H); padding columns/rows
    # are zero, which keeps padded h/c lanes exactly zero through the recurrence.
    wx_p = jnp.zeros((I, 4 * Hp), f32)
    wh_p = jnp.zeros((Hp, 4 * Hp), f32)
    bias_p = jnp.zeros((4 * Hp,), f32)
    for g in range(4):
        wx_p = wx_p.at[:, g * Hp:g * Hp + H].set(wx_t[:, g * H:(g + 1) * H])
        wh_p = wh_p.at[:H, g * Hp:g * Hp + H].set(wh_t[:, g * H:(g + 1) * H])
        bias_p = bias_p.at[g * Hp:g * Hp + H].set(bias[g * H:(g + 1) * H])

    # Hoisted, time-parallel input projection: one big matmul (M = B*T) instead
    # of T tiny M=B matmuls inside the recurrence. Produced directly time-major.
    xw = jnp.einsum('bti,ik->tbk', x.astype(f32), wx_p) + bias_p   # (T, B, 4Hp)
    xw = jnp.pad(xw, ((0, Tp - T), (0, Bp - B), (0, 0)))

    h0 = jnp.pad(hidden[0][0].astype(f32), ((0, Bp - B), (0, Hp - H)))
    c0 = jnp.pad(hidden[1][0].astype(f32), ((0, Bp - B), (0, Hp - H)))
    lens_p = jnp.pad(lens.astype(jnp.int32), (0, Bp - B)).reshape(Bp, 1)

    kernel = functools.partial(_lstm_rec_kernel, t_block=Tb, hidden_pad=Hp)

    out_tm, h_f, c_f = pl.pallas_call(
        kernel,
        out_shape=(
            jax.ShapeDtypeStruct((Tp, Bp, Hp), f32),
            jax.ShapeDtypeStruct((Bp, Hp), f32),
            jax.ShapeDtypeStruct((Bp, Hp), f32),
        ),
        grid_spec=pltpu.PrefetchScalarGridSpec(
            num_scalar_prefetch=0,
            grid=(Tp // Tb,),
            in_specs=[
                pl.BlockSpec((Tb, Bp, 4 * Hp), lambda i: (i, 0, 0)),  # xW slab
                pl.BlockSpec((Hp, 4 * Hp), lambda i: (0, 0)),         # Wh
                pl.BlockSpec((Bp, 1), lambda i: (0, 0)),              # lens
                pl.BlockSpec((Bp, Hp), lambda i: (0, 0)),             # h0
                pl.BlockSpec((Bp, Hp), lambda i: (0, 0)),             # c0
            ],
            out_specs=[
                pl.BlockSpec((Tb, Bp, Hp), lambda i: (i, 0, 0)),      # outputs
                pl.BlockSpec((Bp, Hp), lambda i: (0, 0)),             # final h
                pl.BlockSpec((Bp, Hp), lambda i: (0, 0)),             # final c
            ],
        ),
        compiler_params=pltpu.CompilerParams(
            dimension_semantics=("arbitrary",)),
    )(xw, wh_p, lens_p, h0, c0)

    output = jnp.transpose(out_tm[:T, :B, :H], (1, 0, 2))             # (B, T, H)
    return output, (h_f[:B, :H][None], c_f[:B, :H][None])             # (1, B, H)


def _xavier_normal(key, shape):
    fan_out, fan_in = shape
    std = float(np.sqrt(2.0 / (fan_in + fan_out)))
    return std * jax.random.normal(key, shape, dtype=jnp.float32)


def _reference_lstm(x, lens, hidden, params):
    """Pure-JAX reference (lax.scan) with identical packed-sequence semantics."""
    w_ih, w_hh, b_ih, b_hh = params
    H = w_hh.shape[1]
    h0, c0 = hidden[0][0], hidden[1][0]

    def step(carry, inp):
        h, c = carry
        x_t, t = inp
        gates = x_t @ w_ih.T + h @ w_hh.T + b_ih + b_hh
        i = jax.nn.sigmoid(gates[:, 0 * H:1 * H])
        f = jax.nn.sigmoid(gates[:, 1 * H:2 * H])
        g = jnp.tanh(gates[:, 2 * H:3 * H])
        o = jax.nn.sigmoid(gates[:, 3 * H:4 * H])
        c_new = f * c + i * g
        h_new = o * jnp.tanh(c_new)
        mask = (lens > t)[:, None]
        h_u = jnp.where(mask, h_new, h)
        c_u = jnp.where(mask, c_new, c)
        out = jnp.where(mask, h_new, 0.0)
        return (h_u, c_u), out

    T = x.shape[1]
    (h_f, c_f), outs = lax.scan(step, (h0, c0),
                                (jnp.transpose(x, (1, 0, 2)), jnp.arange(T)))
    return jnp.transpose(outs, (1, 0, 2)), (h_f[None], c_f[None])


if __name__ == "__main__":
    B, T, I, H = 2, 8, 16, 32
    key = jax.random.PRNGKey(0)
    k_x, k_wih, k_whh = jax.random.split(key, 3)

    # Deterministic parameter init mirroring the module's init_weights():
    # xavier_normal_ on matrices, zeros on biases. layer_num = 1 (no dropout).
    w_ih = _xavier_normal(k_wih, (4 * H, I))
    w_hh = _xavier_normal(k_whh, (4 * H, H))
    b_ih = jnp.zeros((4 * H,), jnp.float32)
    b_hh = jnp.zeros((4 * H,), jnp.float32)
    params = (w_ih, w_hh, b_ih, b_hh)

    x = jax.random.normal(k_x, (B, T, I), dtype=jnp.float32)
    lens = jnp.array([T, 5], dtype=jnp.int32)          # descending, lens[0] == T
    hidden = (jnp.zeros((1, B, H), jnp.float32),       # init_hidden(batch_size)
              jnp.zeros((1, B, H), jnp.float32))

    out, (h, c) = lstm_forward(x, lens, hidden, params)
    jax.block_until_ready((out, h, c))

    ref_out, (ref_h, ref_c) = _reference_lstm(x, lens, hidden, params)
    np.testing.assert_allclose(np.asarray(out), np.asarray(ref_out), atol=1e-5, rtol=1e-5)
    np.testing.assert_allclose(np.asarray(h), np.asarray(ref_h), atol=1e-5, rtol=1e-5)
    np.testing.assert_allclose(np.asarray(c), np.asarray(ref_c), atol=1e-5, rtol=1e-5)

    print("KERNEL_OK")
</pallas_src>

<mosaic_0001>
module attributes {stable_mosaic.version = 11 : i64} {
  func.func @_lstm_rec_kernel(%arg0: i32, %arg1: memref<8x8x512xf32, #tpu.memory_space<vmem>>, %arg2: memref<128x512xf32, #tpu.memory_space<vmem>>, %arg3: memref<8x1xi32, #tpu.memory_space<vmem>>, %arg4: memref<8x128xf32, #tpu.memory_space<vmem>>, %arg5: memref<8x128xf32, #tpu.memory_space<vmem>>, %arg6: memref<8x8x128xf32, #tpu.memory_space<vmem>>, %arg7: memref<8x128xf32, #tpu.memory_space<vmem>>, %arg8: memref<8x128xf32, #tpu.memory_space<vmem>>) attributes {dimension_semantics = [#tpu.dimension_semantics<arbitrary>], iteration_bounds = array<i64: 1>, scalar_prefetch = 0 : i64, scratch_operands = 0 : i64, tpu.core_type = #tpu.core_type<tc>, window_params = [{transform_indices = @transform_0, window_bounds = array<i64: 8, 8, 512>}, {pipeline_mode = #tpu.pipeline_mode<synchronous>, transform_indices = @transform_1, window_bounds = array<i64: 128, 512>}, {pipeline_mode = #tpu.pipeline_mode<synchronous>, transform_indices = @transform_2, window_bounds = array<i64: 8, 1>}, {pipeline_mode = #tpu.pipeline_mode<synchronous>, transform_indices = @transform_3, window_bounds = array<i64: 8, 128>}, {pipeline_mode = #tpu.pipeline_mode<synchronous>, transform_indices = @transform_4, window_bounds = array<i64: 8, 128>}, {transform_indices = @transform_5, window_bounds = array<i64: 8, 8, 128>}, {pipeline_mode = #tpu.pipeline_mode<synchronous>, transform_indices = @transform_6, window_bounds = array<i64: 8, 128>}, {pipeline_mode = #tpu.pipeline_mode<synchronous>, transform_indices = @transform_7, window_bounds = array<i64: 8, 128>}]} {
    %c0_i32 = arith.constant 0 : i32
    %0 = arith.cmpi eq, %arg0, %c0_i32 : i32
    %1 = arith.extui %0 : i1 to i32
    %c0_i32_0 = arith.constant 0 : i32
    %2 = arith.cmpi ne, %1, %c0_i32_0 : i32
    scf.if %2 {
      %c0_85 = arith.constant 0 : index
      %c0_86 = arith.constant 0 : index
      %386 = vector.load %arg4[%c0_85, %c0_86] : memref<8x128xf32, #tpu.memory_space<vmem>>, vector<8x128xf32>
      %c0_87 = arith.constant 0 : index
      %c0_88 = arith.constant 0 : index
      %387 = vector.load %arg7[%c0_87, %c0_88] : memref<8x128xf32, #tpu.memory_space<vmem>>, vector<8x128xf32>
      tpu.vector_store %arg7[%c0_87, %c0_88], %386 {strides = array<i32>} : memref<8x128xf32, #tpu.memory_space<vmem>>, vector<8x128xf32>,
      %c0_89 = arith.constant 0 : index
      %c0_90 = arith.constant 0 : index
      %388 = vector.load %arg5[%c0_89, %c0_90] : memref<8x128xf32, #tpu.memory_space<vmem>>, vector<8x128xf32>
      %c0_91 = arith.constant 0 : index
      %c0_92 = arith.constant 0 : index
      %389 = vector.load %arg8[%c0_91, %c0_92] : memref<8x128xf32, #tpu.memory_space<vmem>>, vector<8x128xf32>
      tpu.vector_store %arg8[%c0_91, %c0_92], %388 {strides = array<i32>} : memref<8x128xf32, #tpu.memory_space<vmem>>, vector<8x128xf32>,
    } else {
    }
    %c0 = arith.constant 0 : index
    %c0_1 = arith.constant 0 : index
    %3 = vector.load %arg2[%c0, %c0_1] : memref<128x512xf32, #tpu.memory_space<vmem>>, vector<128x512xf32>
    %c0_2 = arith.constant 0 : index
    %c0_3 = arith.constant 0 : index
    %4 = vector.load %arg3[%c0_2, %c0_3] : memref<8x1xi32, #tpu.memory_space<vmem>>, vector<8x1xi32>
    %c8_i32 = arith.constant 8 : i32
    %5 = arith.muli %arg0, %c8_i32 : i32
    %c0_4 = arith.constant 0 : index
    %c0_5 = arith.constant 0 : index
    %6 = vector.load %arg7[%c0_4, %c0_5] : memref<8x128xf32, #tpu.memory_space<vmem>>, vector<8x128xf32>
    %c0_6 = arith.constant 0 : index
    %c0_7 = arith.constant 0 : index
    %7 = vector.load %arg8[%c0_6, %c0_7] : memref<8x128xf32, #tpu.memory_space<vmem>>, vector<8x128xf32>
    %c0_i32_8 = arith.constant 0 : i32
    %8 = arith.addi %5, %c0_i32_8 : i32
    %9 = arith.index_cast %c0_i32_8 : i32 to index
    %c0_9 = arith.constant 0 : index
    %c0_10 = arith.constant 0 : index
    %10 = vector.load %arg1[%9, %c0_9, %c0_10] : memref<8x8x512xf32, #tpu.memory_space<vmem>>, vector<1x8x512xf32>
    %11 = vector.shape_cast %10 : vector<1x8x512xf32> to vector<8x512xf32>
    %cst = arith.constant dense<0.000000e+00> : vector<8x512xf32>
    %12 = tpu.matmul %6, %3, %cst {dimension_numbers = #tpu.dot_dimension_numbers<[1], [0], [0], [1], [0, 0, 1, 1], [], []>} : vector<8x128xf32>, vector<128x512xf32>, vector<8x512xf32> -> vector<8x512xf32>
    %13 = arith.addf %11, %12 : vector<8x512xf32>
    %14 = vector.extract_strided_slice %13 {offsets = [0, 0], sizes = [8, 128], strides = [1, 1]} : vector<8x512xf32> to vector<8x128xf32>
    %15 = arith.negf %14 : vector<8x128xf32>
    %16 = math.exp %15 : vector<8x128xf32>
    %cst_11 = arith.constant 1.000000e+00 : f32
    %17 = vector.broadcast %cst_11 : f32 to vector<8x128xf32>
    %18 = arith.addf %17, %16 : vector<8x128xf32>
    %19 = arith.divf %17, %18 : vector<8x128xf32>
    %20 = vector.extract_strided_slice %13 {offsets = [0, 128], sizes = [8, 128], strides = [1, 1]} : vector<8x512xf32> to vector<8x128xf32>
    %21 = arith.negf %20 : vector<8x128xf32>
    %22 = math.exp %21 : vector<8x128xf32>
    %cst_12 = arith.constant 1.000000e+00 : f32
    %23 = vector.broadcast %cst_12 : f32 to vector<8x128xf32>
    %24 = arith.addf %23, %22 : vector<8x128xf32>
    %25 = arith.divf %23, %24 : vector<8x128xf32>
    %26 = vector.extract_strided_slice %13 {offsets = [0, 256], sizes = [8, 128], strides = [1, 1]} : vector<8x512xf32> to vector<8x128xf32>
    %27 = math.tanh %26 : vector<8x128xf32>
    %28 = vector.extract_strided_slice %13 {offsets = [0, 384], sizes = [8, 128], strides = [1, 1]} : vector<8x512xf32> to vector<8x128xf32>
    %29 = arith.negf %28 : vector<8x128xf32>
    %30 = math.exp %29 : vector<8x128xf32>
    %cst_13 = arith.constant 1.000000e+00 : f32
    %31 = vector.broadcast %cst_13 : f32 to vector<8x128xf32>
    %32 = arith.addf %31, %30 : vector<8x128xf32>
    %33 = arith.divf %31, %32 : vector<8x128xf32>
    %34 = arith.mulf %25, %7 : vector<8x128xf32>
    %35 = arith.mulf %19, %27 : vector<8x128xf32>
    %36 = arith.addf %34, %35 : vector<8x128xf32>
    %37 = math.tanh %36 : vector<8x128xf32>
    %38 = arith.mulf %33, %37 : vector<8x128xf32>
    %39 = vector.broadcast %8 : i32 to vector<8x1xi32>
    %40 = arith.cmpi sgt, %4, %39 : vector<8x1xi32>
    %41 = vector.shape_cast %40 : vector<8x1xi1> to vector<8x1xi1>
    %42 = vector.broadcast %41 : vector<8x1xi1> to vector<8x128xi1>
    %43 = arith.select %42, %38, %6 : vector<8x128xi1>, vector<8x128xf32>
    %44 = vector.shape_cast %40 : vector<8x1xi1> to vector<8x1xi1>
    %45 = vector.broadcast %44 : vector<8x1xi1> to vector<8x128xi1>
    %46 = arith.select %45, %36, %7 : vector<8x128xi1>, vector<8x128xf32>
    %cst_14 = arith.constant 0.000000e+00 : f32
    %47 = vector.shape_cast %40 : vector<8x1xi1> to vector<8x1xi1>
    %48 = vector.broadcast %47 : vector<8x1xi1> to vector<8x128xi1>
    %49 = vector.broadcast %cst_14 : f32 to vector<8x128xf32>
    %50 = arith.select %48, %38, %49 : vector<8x128xi1>, vector<8x128xf32>
    %51 = arith.index_cast %c0_i32_8 : i32 to index
    %c0_15 = arith.constant 0 : index
    %c0_16 = arith.constant 0 : index
    %52 = vector.load %arg6[%51, %c0_15, %c0_16] : memref<8x8x128xf32, #tpu.memory_space<vmem>>, vector<1x8x128xf32>
    %53 = vector.shape_cast %52 : vector<1x8x128xf32> to vector<8x128xf32>
    %54 = vector.shape_cast %50 : vector<8x128xf32> to vector<1x8x128xf32>
    tpu.vector_store %arg6[%51, %c0_15, %c0_16], %54 {strides = array<i32>} : memref<8x8x128xf32, #tpu.memory_space<vmem>>, vector<1x8x128xf32>,
    %c1_i32 = arith.constant 1 : i32
    %55 = arith.addi %5, %c1_i32 : i32
    %56 = arith.index_cast %c1_i32 : i32 to index
    %c0_17 = arith.constant 0 : index
    %c0_18 = arith.constant 0 : index
    %57 = vector.load %arg1[%56, %c0_17, %c0_18] : memref<8x8x512xf32, #tpu.memory_space<vmem>>, vector<1x8x512xf32>
    %58 = vector.shape_cast %57 : vector<1x8x512xf32> to vector<8x512xf32>
    %cst_19 = arith.constant dense<0.000000e+00> : vector<8x512xf32>
    %59 = tpu.matmul %43, %3, %cst_19 {dimension_numbers = #tpu.dot_dimension_numbers<[1], [0], [0], [1], [0, 0, 1, 1], [], []>} : vector<8x128xf32>, vector<128x512xf32>, vector<8x512xf32> -> vector<8x512xf32>
    %60 = arith.addf %58, %59 : vector<8x512xf32>
    %61 = vector.extract_strided_slice %60 {offsets = [0, 0], sizes = [8, 128], strides = [1, 1]} : vector<8x512xf32> to vector<8x128xf32>
    %62 = arith.negf %61 : vector<8x128xf32>
    %63 = math.exp %62 : vector<8x128xf32>
    %cst_20 = arith.constant 1.000000e+00 : f32
    %64 = vector.broadcast %cst_20 : f32 to vector<8x128xf32>
    %65 = arith.addf %64, %63 : vector<8x128xf32>
    %66 = arith.divf %64, %65 : vector<8x128xf32>
    %67 = vector.extract_strided_slice %60 {offsets = [0, 128], sizes = [8, 128], strides = [1, 1]} : vector<8x512xf32> to vector<8x128xf32>
    %68 = arith.negf %67 : vector<8x128xf32>
    %69 = math.exp %68 : vector<8x128xf32>
    %cst_21 = arith.constant 1.000000e+00 : f32
    %70 = vector.broadcast %cst_21 : f32 to vector<8x128xf32>
    %71 = arith.addf %70, %69 : vector<8x128xf32>
    %72 = arith.divf %70, %71 : vector<8x128xf32>
    %73 = vector.extract_strided_slice %60 {offsets = [0, 256], sizes = [8, 128], strides = [1, 1]} : vector<8x512xf32> to vector<8x128xf32>
    %74 = math.tanh %73 : vector<8x128xf32>
    %75 = vector.extract_strided_slice %60 {offsets = [0, 384], sizes = [8, 128], strides = [1, 1]} : vector<8x512xf32> to vector<8x128xf32>
    %76 = arith.negf %75 : vector<8x128xf32>
    %77 = math.exp %76 : vector<8x128xf32>
    %cst_22 = arith.constant 1.000000e+00 : f32
    %78 = vector.broadcast %cst_22 : f32 to vector<8x128xf32>
    %79 = arith.addf %78, %77 : vector<8x128xf32>
    %80 = arith.divf %78, %79 : vector<8x128xf32>
    %81 = arith.mulf %72, %46 : vector<8x128xf32>
    %82 = arith.mulf %66, %74 : vector<8x128xf32>
    %83 = arith.addf %81, %82 : vector<8x128xf32>
    %84 = math.tanh %83 : vector<8x128xf32>
    %85 = arith.mulf %80, %84 : vector<8x128xf32>
    %86 = vector.broadcast %55 : i32 to vector<8x1xi32>
    %87 = arith.cmpi sgt, %4, %86 : vector<8x1xi32>
    %88 = vector.shape_cast %87 : vector<8x1xi1> to vector<8x1xi1>
    %89 = vector.broadcast %88 : vector<8x1xi1> to vector<8x128xi1>
    %90 = arith.select %89, %85, %43 : vector<8x128xi1>, vector<8x128xf32>
    %91 = vector.shape_cast %87 : vector<8x1xi1> to vector<8x1xi1>
    %92 = vector.broadcast %91 : vector<8x1xi1> to vector<8x128xi1>
    %93 = arith.select %92, %83, %46 : vector<8x128xi1>, vector<8x128xf32>
    %cst_23 = arith.constant 0.000000e+00 : f32
    %94 = vector.shape_cast %87 : vector<8x1xi1> to vector<8x1xi1>
    %95 = vector.broadcast %94 : vector<8x1xi1> to vector<8x128xi1>
    %96 = vector.broadcast %cst_23 : f32 to vector<8x128xf32>
    %97 = arith.select %95, %85, %96 : vector<8x128xi1>, vector<8x128xf32>
    %98 = arith.index_cast %c1_i32 : i32 to index
    %c0_24 = arith.constant 0 : index
    %c0_25 = arith.constant 0 : index
    %99 = vector.load %arg6[%98, %c0_24, %c0_25] : memref<8x8x128xf32, #tpu.memory_space<vmem>>, vector<1x8x128xf32>
    %100 = vector.shape_cast %99 : vector<1x8x128xf32> to vector<8x128xf32>
    %101 = vector.shape_cast %97 : vector<8x128xf32> to vector<1x8x128xf32>
    tpu.vector_store %arg6[%98, %c0_24, %c0_25], %101 {strides = array<i32>} : memref<8x8x128xf32, #tpu.memory_space<vmem>>, vector<1x8x128xf32>,
    %c2_i32 = arith.constant 2 : i32
    %102 = arith.addi %5, %c2_i32 : i32
    %103 = arith.index_cast %c2_i32 : i32 to index
    %c0_26 = arith.constant 0 : index
    %c0_27 = arith.constant 0 : index
    %104 = vector.load %arg1[%103, %c0_26, %c0_27] : memref<8x8x512xf32, #tpu.memory_space<vmem>>, vector<1x8x512xf32>
    %105 = vector.shape_cast %104 : vector<1x8x512xf32> to vector<8x512xf32>
    %cst_28 = arith.constant dense<0.000000e+00> : vector<8x512xf32>
    %106 = tpu.matmul %90, %3, %cst_28 {dimension_numbers = #tpu.dot_dimension_numbers<[1], [0], [0], [1], [0, 0, 1, 1], [], []>} : vector<8x128xf32>, vector<128x512xf32>, vector<8x512xf32> -> vector<8x512xf32>
    %107 = arith.addf %105, %106 : vector<8x512xf32>
    %108 = vector.extract_strided_slice %107 {offsets = [0, 0], sizes = [8, 128], strides = [1, 1]} : vector<8x512xf32> to vector<8x128xf32>
    %109 = arith.negf %108 : vector<8x128xf32>
    %110 = math.exp %109 : vector<8x128xf32>
    %cst_29 = arith.constant 1.000000e+00 : f32
    %111 = vector.broadcast %cst_29 : f32 to vector<8x128xf32>
    %112 = arith.addf %111, %110 : vector<8x128xf32>
    %113 = arith.divf %111, %112 : vector<8x128xf32>
    %114 = vector.extract_strided_slice %107 {offsets = [0, 128], sizes = [8, 128], strides = [1, 1]} : vector<8x512xf32> to vector<8x128xf32>
    %115 = arith.negf %114 : vector<8x128xf32>
    %116 = math.exp %115 : vector<8x128xf32>
    %cst_30 = arith.constant 1.000000e+00 : f32
    %117 = vector.broadcast %cst_30 : f32 to vector<8x128xf32>
    %118 = arith.addf %117, %116 : vector<8x128xf32>
    %119 = arith.divf %117, %118 : vector<8x128xf32>
    %120 = vector.extract_strided_slice %107 {offsets = [0, 256], sizes = [8, 128], strides = [1, 1]} : vector<8x512xf32> to vector<8x128xf32>
    %121 = math.tanh %120 : vector<8x128xf32>
    %122 = vector.extract_strided_slice %107 {offsets = [0, 384], sizes = [8, 128], strides = [1, 1]} : vector<8x512xf32> to vector<8x128xf32>
    %123 = arith.negf %122 : vector<8x128xf32>
    %124 = math.exp %123 : vector<8x128xf32>
    %cst_31 = arith.constant 1.000000e+00 : f32
    %125 = vector.broadcast %cst_31 : f32 to vector<8x128xf32>
    %126 = arith.addf %125, %124 : vector<8x128xf32>
    %127 = arith.divf %125, %126 : vector<8x128xf32>
    %128 = arith.mulf %119, %93 : vector<8x128xf32>
    %129 = arith.mulf %113, %121 : vector<8x128xf32>
    %130 = arith.addf %128, %129 : vector<8x128xf32>
    %131 = math.tanh %130 : vector<8x128xf32>
    %132 = arith.mulf %127, %131 : vector<8x128xf32>
    %133 = vector.broadcast %102 : i32 to vector<8x1xi32>
    %134 = arith.cmpi sgt, %4, %133 : vector<8x1xi32>
    %135 = vector.shape_cast %134 : vector<8x1xi1> to vector<8x1xi1>
    %136 = vector.broadcast %135 : vector<8x1xi1> to vector<8x128xi1>
    %137 = arith.select %136, %132, %90 : vector<8x128xi1>, vector<8x128xf32>
    %138 = vector.shape_cast %134 : vector<8x1xi1> to vector<8x1xi1>
    %139 = vector.broadcast %138 : vector<8x1xi1> to vector<8x128xi1>
    %140 = arith.select %139, %130, %93 : vector<8x128xi1>, vector<8x128xf32>
    %cst_32 = arith.constant 0.000000e+00 : f32
    %141 = vector.shape_cast %134 : vector<8x1xi1> to vector<8x1xi1>
    %142 = vector.broadcast %141 : vector<8x1xi1> to vector<8x128xi1>
    %143 = vector.broadcast %cst_32 : f32 to vector<8x128xf32>
    %144 = arith.select %142, %132, %143 : vector<8x128xi1>, vector<8x128xf32>
    %145 = arith.index_cast %c2_i32 : i32 to index
    %c0_33 = arith.constant 0 : index
    %c0_34 = arith.constant 0 : index
    %146 = vector.load %arg6[%145, %c0_33, %c0_34] : memref<8x8x128xf32, #tpu.memory_space<vmem>>, vector<1x8x128xf32>
    %147 = vector.shape_cast %146 : vector<1x8x128xf32> to vector<8x128xf32>
    %148 = vector.shape_cast %144 : vector<8x128xf32> to vector<1x8x128xf32>
    tpu.vector_store %arg6[%145, %c0_33, %c0_34], %148 {strides = array<i32>} : memref<8x8x128xf32, #tpu.memory_space<vmem>>, vector<1x8x128xf32>,
    %c3_i32 = arith.constant 3 : i32
    %149 = arith.addi %5, %c3_i32 : i32
    %150 = arith.index_cast %c3_i32 : i32 to index
    %c0_35 = arith.constant 0 : index
    %c0_36 = arith.constant 0 : index
    %151 = vector.load %arg1[%150, %c0_35, %c0_36] : memref<8x8x512xf32, #tpu.memory_space<vmem>>, vector<1x8x512xf32>
    %152 = vector.shape_cast %151 : vector<1x8x512xf32> to vector<8x512xf32>
    %cst_37 = arith.constant dense<0.000000e+00> : vector<8x512xf32>
    %153 = tpu.matmul %137, %3, %cst_37 {dimension_numbers = #tpu.dot_dimension_numbers<[1], [0], [0], [1], [0, 0, 1, 1], [], []>} : vector<8x128xf32>, vector<128x512xf32>, vector<8x512xf32> -> vector<8x512xf32>
    %154 = arith.addf %152, %153 : vector<8x512xf32>
    %155 = vector.extract_strided_slice %154 {offsets = [0, 0], sizes = [8, 128], strides = [1, 1]} : vector<8x512xf32> to vector<8x128xf32>
    %156 = arith.negf %155 : vector<8x128xf32>
    %157 = math.exp %156 : vector<8x128xf32>
    %cst_38 = arith.constant 1.000000e+00 : f32
    %158 = vector.broadcast %cst_38 : f32 to vector<8x128xf32>
    %159 = arith.addf %158, %157 : vector<8x128xf32>
    %160 = arith.divf %158, %159 : vector<8x128xf32>
    %161 = vector.extract_strided_slice %154 {offsets = [0, 128], sizes = [8, 128], strides = [1, 1]} : vector<8x512xf32> to vector<8x128xf32>
    %162 = arith.negf %161 : vector<8x128xf32>
    %163 = math.exp %162 : vector<8x128xf32>
    %cst_39 = arith.constant 1.000000e+00 : f32
    %164 = vector.broadcast %cst_39 : f32 to vector<8x128xf32>
    %165 = arith.addf %164, %163 : vector<8x128xf32>
    %166 = arith.divf %164, %165 : vector<8x128xf32>
    %167 = vector.extract_strided_slice %154 {offsets = [0, 256], sizes = [8, 128], strides = [1, 1]} : vector<8x512xf32> to vector<8x128xf32>
    %168 = math.tanh %167 : vector<8x128xf32>
    %169 = vector.extract_strided_slice %154 {offsets = [0, 384], sizes = [8, 128], strides = [1, 1]} : vector<8x512xf32> to vector<8x128xf32>
    %170 = arith.negf %169 : vector<8x128xf32>
    %171 = math.exp %170 : vector<8x128xf32>
    %cst_40 = arith.constant 1.000000e+00 : f32
    %172 = vector.broadcast %cst_40 : f32 to vector<8x128xf32>
    %173 = arith.addf %172, %171 : vector<8x128xf32>
    %174 = arith.divf %172, %173 : vector<8x128xf32>
    %175 = arith.mulf %166, %140 : vector<8x128xf32>
    %176 = arith.mulf %160, %168 : vector<8x128xf32>
    %177 = arith.addf %175, %176 : vector<8x128xf32>
    %178 = math.tanh %177 : vector<8x128xf32>
    %179 = arith.mulf %174, %178 : vector<8x128xf32>
    %180 = vector.broadcast %149 : i32 to vector<8x1xi32>
    %181 = arith.cmpi sgt, %4, %180 : vector<8x1xi32>
    %182 = vector.shape_cast %181 : vector<8x1xi1> to vector<8x1xi1>
    %183 = vector.broadcast %182 : vector<8x1xi1> to vector<8x128xi1>
    %184 = arith.select %183, %179, %137 : vector<8x128xi1>, vector<8x128xf32>
    %185 = vector.shape_cast %181 : vector<8x1xi1> to vector<8x1xi1>
    %186 = vector.broadcast %185 : vector<8x1xi1> to vector<8x128xi1>
    %187 = arith.select %186, %177, %140 : vector<8x128xi1>, vector<8x128xf32>
    %cst_41 = arith.constant 0.000000e+00 : f32
    %188 = vector.shape_cast %181 : vector<8x1xi1> to vector<8x1xi1>
    %189 = vector.broadcast %188 : vector<8x1xi1> to vector<8x128xi1>
    %190 = vector.broadcast %cst_41 : f32 to vector<8x128xf32>
    %191 = arith.select %189, %179, %190 : vector<8x128xi1>, vector<8x128xf32>
    %192 = arith.index_cast %c3_i32 : i32 to index
    %c0_42 = arith.constant 0 : index
    %c0_43 = arith.constant 0 : index
    %193 = vector.load %arg6[%192, %c0_42, %c0_43] : memref<8x8x128xf32, #tpu.memory_space<vmem>>, vector<1x8x128xf32>
    %194 = vector.shape_cast %193 : vector<1x8x128xf32> to vector<8x128xf32>
    %195 = vector.shape_cast %191 : vector<8x128xf32> to vector<1x8x128xf32>
    tpu.vector_store %arg6[%192, %c0_42, %c0_43], %195 {strides = array<i32>} : memref<8x8x128xf32, #tpu.memory_space<vmem>>, vector<1x8x128xf32>,
    %c4_i32 = arith.constant 4 : i32
    %196 = arith.addi %5, %c4_i32 : i32
    %197 = arith.index_cast %c4_i32 : i32 to index
    %c0_44 = arith.constant 0 : index
    %c0_45 = arith.constant 0 : index
    %198 = vector.load %arg1[%197, %c0_44, %c0_45] : memref<8x8x512xf32, #tpu.memory_space<vmem>>, vector<1x8x512xf32>
    %199 = vector.shape_cast %198 : vector<1x8x512xf32> to vector<8x512xf32>
    %cst_46 = arith.constant dense<0.000000e+00> : vector<8x512xf32>
    %200 = tpu.matmul %184, %3, %cst_46 {dimension_numbers = #tpu.dot_dimension_numbers<[1], [0], [0], [1], [0, 0, 1, 1], [], []>} : vector<8x128xf32>, vector<128x512xf32>, vector<8x512xf32> -> vector<8x512xf32>
    %201 = arith.addf %199, %200 : vector<8x512xf32>
    %202 = vector.extract_strided_slice %201 {offsets = [0, 0], sizes = [8, 128], strides = [1, 1]} : vector<8x512xf32> to vector<8x128xf32>
    %203 = arith.negf %202 : vector<8x128xf32>
    %204 = math.exp %203 : vector<8x128xf32>
    %cst_47 = arith.constant 1.000000e+00 : f32
    %205 = vector.broadcast %cst_47 : f32 to vector<8x128xf32>
    %206 = arith.addf %205, %204 : vector<8x128xf32>
    %207 = arith.divf %205, %206 : vector<8x128xf32>
    %208 = vector.extract_strided_slice %201 {offsets = [0, 128], sizes = [8, 128], strides = [1, 1]} : vector<8x512xf32> to vector<8x128xf32>
    %209 = arith.negf %208 : vector<8x128xf32>
    %210 = math.exp %209 : vector<8x128xf32>
    %cst_48 = arith.constant 1.000000e+00 : f32
    %211 = vector.broadcast %cst_48 : f32 to vector<8x128xf32>
    %212 = arith.addf %211, %210 : vector<8x128xf32>
    %213 = arith.divf %211, %212 : vector<8x128xf32>
    %214 = vector.extract_strided_slice %201 {offsets = [0, 256], sizes = [8, 128], strides = [1, 1]} : vector<8x512xf32> to vector<8x128xf32>
    %215 = math.tanh %214 : vector<8x128xf32>
    %216 = vector.extract_strided_slice %201 {offsets = [0, 384], sizes = [8, 128], strides = [1, 1]} : vector<8x512xf32> to vector<8x128xf32>
    %217 = arith.negf %216 : vector<8x128xf32>
    %218 = math.exp %217 : vector<8x128xf32>
    %cst_49 = arith.constant 1.000000e+00 : f32
    %219 = vector.broadcast %cst_49 : f32 to vector<8x128xf32>
    %220 = arith.addf %219, %218 : vector<8x128xf32>
    %221 = arith.divf %219, %220 : vector<8x128xf32>
    %222 = arith.mulf %213, %187 : vector<8x128xf32>
    %223 = arith.mulf %207, %215 : vector<8x128xf32>
    %224 = arith.addf %222, %223 : vector<8x128xf32>
    %225 = math.tanh %224 : vector<8x128xf32>
    %226 = arith.mulf %221, %225 : vector<8x128xf32>
    %227 = vector.broadcast %196 : i32 to vector<8x1xi32>
    %228 = arith.cmpi sgt, %4, %227 : vector<8x1xi32>
    %229 = vector.shape_cast %228 : vector<8x1xi1> to vector<8x1xi1>
    %230 = vector.broadcast %229 : vector<8x1xi1> to vector<8x128xi1>
    %231 = arith.select %230, %226, %184 : vector<8x128xi1>, vector<8x128xf32>
    %232 = vector.shape_cast %228 : vector<8x1xi1> to vector<8x1xi1>
    %233 = vector.broadcast %232 : vector<8x1xi1> to vector<8x128xi1>
    %234 = arith.select %233, %224, %187 : vector<8x128xi1>, vector<8x128xf32>
    %cst_50 = arith.constant 0.000000e+00 : f32
    %235 = vector.shape_cast %228 : vector<8x1xi1> to vector<8x1xi1>
    %236 = vector.broadcast %235 : vector<8x1xi1> to vector<8x128xi1>
    %237 = vector.broadcast %cst_50 : f32 to vector<8x128xf32>
    %238 = arith.select %236, %226, %237 : vector<8x128xi1>, vector<8x128xf32>
    %239 = arith.index_cast %c4_i32 : i32 to index
    %c0_51 = arith.constant 0 : index
    %c0_52 = arith.constant 0 : index
    %240 = vector.load %arg6[%239, %c0_51, %c0_52] : memref<8x8x128xf32, #tpu.memory_space<vmem>>, vector<1x8x128xf32>
    %241 = vector.shape_cast %240 : vector<1x8x128xf32> to vector<8x128xf32>
    %242 = vector.shape_cast %238 : vector<8x128xf32> to vector<1x8x128xf32>
    tpu.vector_store %arg6[%239, %c0_51, %c0_52], %242 {strides = array<i32>} : memref<8x8x128xf32, #tpu.memory_space<vmem>>, vector<1x8x128xf32>,
    %c5_i32 = arith.constant 5 : i32
    %243 = arith.addi %5, %c5_i32 : i32
    %244 = arith.index_cast %c5_i32 : i32 to index
    %c0_53 = arith.constant 0 : index
    %c0_54 = arith.constant 0 : index
    %245 = vector.load %arg1[%244, %c0_53, %c0_54] : memref<8x8x512xf32, #tpu.memory_space<vmem>>, vector<1x8x512xf32>
    %246 = vector.shape_cast %245 : vector<1x8x512xf32> to vector<8x512xf32>
    %cst_55 = arith.constant dense<0.000000e+00> : vector<8x512xf32>
    %247 = tpu.matmul %231, %3, %cst_55 {dimension_numbers = #tpu.dot_dimension_numbers<[1], [0], [0], [1], [0, 0, 1, 1], [], []>} : vector<8x128xf32>, vector<128x512xf32>, vector<8x512xf32> -> vector<8x512xf32>
    %248 = arith.addf %246, %247 : vector<8x512xf32>
    %249 = vector.extract_strided_slice %248 {offsets = [0, 0], sizes = [8, 128], strides = [1, 1]} : vector<8x512xf32> to vector<8x128xf32>
    %250 = arith.negf %249 : vector<8x128xf32>
    %251 = math.exp %250 : vector<8x128xf32>
    %cst_56 = arith.constant 1.000000e+00 : f32
    %252 = vector.broadcast %cst_56 : f32 to vector<8x128xf32>
    %253 = arith.addf %252, %251 : vector<8x128xf32>
    %254 = arith.divf %252, %253 : vector<8x128xf32>
    %255 = vector.extract_strided_slice %248 {offsets = [0, 128], sizes = [8, 128], strides = [1, 1]} : vector<8x512xf32> to vector<8x128xf32>
    %256 = arith.negf %255 : vector<8x128xf32>
    %257 = math.exp %256 : vector<8x128xf32>
    %cst_57 = arith.constant 1.000000e+00 : f32
    %258 = vector.broadcast %cst_57 : f32 to vector<8x128xf32>
    %259 = arith.addf %258, %257 : vector<8x128xf32>
    %260 = arith.divf %258, %259 : vector<8x128xf32>
    %261 = vector.extract_strided_slice %248 {offsets = [0, 256], sizes = [8, 128], strides = [1, 1]} : vector<8x512xf32> to vector<8x128xf32>
    %262 = math.tanh %261 : vector<8x128xf32>
    %263 = vector.extract_strided_slice %248 {offsets = [0, 384], sizes = [8, 128], strides = [1, 1]} : vector<8x512xf32> to vector<8x128xf32>
    %264 = arith.negf %263 : vector<8x128xf32>
    %265 = math.exp %264 : vector<8x128xf32>
    %cst_58 = arith.constant 1.000000e+00 : f32
    %266 = vector.broadcast %cst_58 : f32 to vector<8x128xf32>
    %267 = arith.addf %266, %265 : vector<8x128xf32>
    %268 = arith.divf %266, %267 : vector<8x128xf32>
    %269 = arith.mulf %260, %234 : vector<8x128xf32>
    %270 = arith.mulf %254, %262 : vector<8x128xf32>
    %271 = arith.addf %269, %270 : vector<8x128xf32>
    %272 = math.tanh %271 : vector<8x128xf32>
    %273 = arith.mulf %268, %272 : vector<8x128xf32>
    %274 = vector.broadcast %243 : i32 to vector<8x1xi32>
    %275 = arith.cmpi sgt, %4, %274 : vector<8x1xi32>
    %276 = vector.shape_cast %275 : vector<8x1xi1> to vector<8x1xi1>
    %277 = vector.broadcast %276 : vector<8x1xi1> to vector<8x128xi1>
    %278 = arith.select %277, %273, %231 : vector<8x128xi1>, vector<8x128xf32>
    %279 = vector.shape_cast %275 : vector<8x1xi1> to vector<8x1xi1>
    %280 = vector.broadcast %279 : vector<8x1xi1> to vector<8x128xi1>
    %281 = arith.select %280, %271, %234 : vector<8x128xi1>, vector<8x128xf32>
    %cst_59 = arith.constant 0.000000e+00 : f32
    %282 = vector.shape_cast %275 : vector<8x1xi1> to vector<8x1xi1>
    %283 = vector.broadcast %282 : vector<8x1xi1> to vector<8x128xi1>
    %284 = vector.broadcast %cst_59 : f32 to vector<8x128xf32>
    %285 = arith.select %283, %273, %284 : vector<8x128xi1>, vector<8x128xf32>
    %286 = arith.index_cast %c5_i32 : i32 to index
    %c0_60 = arith.constant 0 : index
    %c0_61 = arith.constant 0 : index
    %287 = vector.load %arg6[%286, %c0_60, %c0_61] : memref<8x8x128xf32, #tpu.memory_space<vmem>>, vector<1x8x128xf32>
    %288 = vector.shape_cast %287 : vector<1x8x128xf32> to vector<8x128xf32>
    %289 = vector.shape_cast %285 : vector<8x128xf32> to vector<1x8x128xf32>
    tpu.vector_store %arg6[%286, %c0_60, %c0_61], %289 {strides = array<i32>} : memref<8x8x128xf32, #tpu.memory_space<vmem>>, vector<1x8x128xf32>,
    %c6_i32 = arith.constant 6 : i32
    %290 = arith.addi %5, %c6_i32 : i32
    %291 = arith.index_cast %c6_i32 : i32 to index
    %c0_62 = arith.constant 0 : index
    %c0_63 = arith.constant 0 : index
    %292 = vector.load %arg1[%291, %c0_62, %c0_63] : memref<8x8x512xf32, #tpu.memory_space<vmem>>, vector<1x8x512xf32>
    %293 = vector.shape_cast %292 : vector<1x8x512xf32> to vector<8x512xf32>
    %cst_64 = arith.constant dense<0.000000e+00> : vector<8x512xf32>
    %294 = tpu.matmul %278, %3, %cst_64 {dimension_numbers = #tpu.dot_dimension_numbers<[1], [0], [0], [1], [0, 0, 1, 1], [], []>} : vector<8x128xf32>, vector<128x512xf32>, vector<8x512xf32> -> vector<8x512xf32>
    %295 = arith.addf %293, %294 : vector<8x512xf32>
    %296 = vector.extract_strided_slice %295 {offsets = [0, 0], sizes = [8, 128], strides = [1, 1]} : vector<8x512xf32> to vector<8x128xf32>
    %297 = arith.negf %296 : vector<8x128xf32>
    %298 = math.exp %297 : vector<8x128xf32>
    %cst_65 = arith.constant 1.000000e+00 : f32
    %299 = vector.broadcast %cst_65 : f32 to vector<8x128xf32>
    %300 = arith.addf %299, %298 : vector<8x128xf32>
    %301 = arith.divf %299, %300 : vector<8x128xf32>
    %302 = vector.extract_strided_slice %295 {offsets = [0, 128], sizes = [8, 128], strides = [1, 1]} : vector<8x512xf32> to vector<8x128xf32>
    %303 = arith.negf %302 : vector<8x128xf32>
    %304 = math.exp %303 : vector<8x128xf32>
    %cst_66 = arith.constant 1.000000e+00 : f32
    %305 = vector.broadcast %cst_66 : f32 to vector<8x128xf32>
    %306 = arith.addf %305, %304 : vector<8x128xf32>
    %307 = arith.divf %305, %306 : vector<8x128xf32>
    %308 = vector.extract_strided_slice %295 {offsets = [0, 256], sizes = [8, 128], strides = [1, 1]} : vector<8x512xf32> to vector<8x128xf32>
    %309 = math.tanh %308 : vector<8x128xf32>
    %310 = vector.extract_strided_slice %295 {offsets = [0, 384], sizes = [8, 128], strides = [1, 1]} : vector<8x512xf32> to vector<8x128xf32>
    %311 = arith.negf %310 : vector<8x128xf32>
    %312 = math.exp %311 : vector<8x128xf32>
    %cst_67 = arith.constant 1.000000e+00 : f32
    %313 = vector.broadcast %cst_67 : f32 to vector<8x128xf32>
    %314 = arith.addf %313, %312 : vector<8x128xf32>
    %315 = arith.divf %313, %314 : vector<8x128xf32>
    %316 = arith.mulf %307, %281 : vector<8x128xf32>
    %317 = arith.mulf %301, %309 : vector<8x128xf32>
    %318 = arith.addf %316, %317 : vector<8x128xf32>
    %319 = math.tanh %318 : vector<8x128xf32>
    %320 = arith.mulf %315, %319 : vector<8x128xf32>
    %321 = vector.broadcast %290 : i32 to vector<8x1xi32>
    %322 = arith.cmpi sgt, %4, %321 : vector<8x1xi32>
    %323 = vector.shape_cast %322 : vector<8x1xi1> to vector<8x1xi1>
    %324 = vector.broadcast %323 : vector<8x1xi1> to vector<8x128xi1>
    %325 = arith.select %324, %320, %278 : vector<8x128xi1>, vector<8x128xf32>
    %326 = vector.shape_cast %322 : vector<8x1xi1> to vector<8x1xi1>
    %327 = vector.broadcast %326 : vector<8x1xi1> to vector<8x128xi1>
    %328 = arith.select %327, %318, %281 : vector<8x128xi1>, vector<8x128xf32>
    %cst_68 = arith.constant 0.000000e+00 : f32
    %329 = vector.shape_cast %322 : vector<8x1xi1> to vector<8x1xi1>
    %330 = vector.broadcast %329 : vector<8x1xi1> to vector<8x128xi1>
    %331 = vector.broadcast %cst_68 : f32 to vector<8x128xf32>
    %332 = arith.select %330, %320, %331 : vector<8x128xi1>, vector<8x128xf32>
    %333 = arith.index_cast %c6_i32 : i32 to index
    %c0_69 = arith.constant 0 : index
    %c0_70 = arith.constant 0 : index
    %334 = vector.load %arg6[%333, %c0_69, %c0_70] : memref<8x8x128xf32, #tpu.memory_space<vmem>>, vector<1x8x128xf32>
    %335 = vector.shape_cast %334 : vector<1x8x128xf32> to vector<8x128xf32>
    %336 = vector.shape_cast %332 : vector<8x128xf32> to vector<1x8x128xf32>
    tpu.vector_store %arg6[%333, %c0_69, %c0_70], %336 {strides = array<i32>} : memref<8x8x128xf32, #tpu.memory_space<vmem>>, vector<1x8x128xf32>,
    %c7_i32 = arith.constant 7 : i32
    %337 = arith.addi %5, %c7_i32 : i32
    %338 = arith.index_cast %c7_i32 : i32 to index
    %c0_71 = arith.constant 0 : index
    %c0_72 = arith.constant 0 : index
    %339 = vector.load %arg1[%338, %c0_71, %c0_72] : memref<8x8x512xf32, #tpu.memory_space<vmem>>, vector<1x8x512xf32>
    %340 = vector.shape_cast %339 : vector<1x8x512xf32> to vector<8x512xf32>
    %cst_73 = arith.constant dense<0.000000e+00> : vector<8x512xf32>
    %341 = tpu.matmul %325, %3, %cst_73 {dimension_numbers = #tpu.dot_dimension_numbers<[1], [0], [0], [1], [0, 0, 1, 1], [], []>} : vector<8x128xf32>, vector<128x512xf32>, vector<8x512xf32> -> vector<8x512xf32>
    %342 = arith.addf %340, %341 : vector<8x512xf32>
    %343 = vector.extract_strided_slice %342 {offsets = [0, 0], sizes = [8, 128], strides = [1, 1]} : vector<8x512xf32> to vector<8x128xf32>
    %344 = arith.negf %343 : vector<8x128xf32>
    %345 = math.exp %344 : vector<8x128xf32>
    %cst_74 = arith.constant 1.000000e+00 : f32
    %346 = vector.broadcast %cst_74 : f32 to vector<8x128xf32>
    %347 = arith.addf %346, %345 : vector<8x128xf32>
    %348 = arith.divf %346, %347 : vector<8x128xf32>
    %349 = vector.extract_strided_slice %342 {offsets = [0, 128], sizes = [8, 128], strides = [1, 1]} : vector<8x512xf32> to vector<8x128xf32>
    %350 = arith.negf %349 : vector<8x128xf32>
    %351 = math.exp %350 : vector<8x128xf32>
    %cst_75 = arith.constant 1.000000e+00 : f32
    %352 = vector.broadcast %cst_75 : f32 to vector<8x128xf32>
    %353 = arith.addf %352, %351 : vector<8x128xf32>
    %354 = arith.divf %352, %353 : vector<8x128xf32>
    %355 = vector.extract_strided_slice %342 {offsets = [0, 256], sizes = [8, 128], strides = [1, 1]} : vector<8x512xf32> to vector<8x128xf32>
    %356 = math.tanh %355 : vector<8x128xf32>
    %357 = vector.extract_strided_slice %342 {offsets = [0, 384], sizes = [8, 128], strides = [1, 1]} : vector<8x512xf32> to vector<8x128xf32>
    %358 = arith.negf %357 : vector<8x128xf32>
    %359 = math.exp %358 : vector<8x128xf32>
    %cst_76 = arith.constant 1.000000e+00 : f32
    %360 = vector.broadcast %cst_76 : f32 to vector<8x128xf32>
    %361 = arith.addf %360, %359 : vector<8x128xf32>
    %362 = arith.divf %360, %361 : vector<8x128xf32>
    %363 = arith.mulf %354, %328 : vector<8x128xf32>
    %364 = arith.mulf %348, %356 : vector<8x128xf32>
    %365 = arith.addf %363, %364 : vector<8x128xf32>
    %366 = math.tanh %365 : vector<8x128xf32>
    %367 = arith.mulf %362, %366 : vector<8x128xf32>
    %368 = vector.broadcast %337 : i32 to vector<8x1xi32>
    %369 = arith.cmpi sgt, %4, %368 : vector<8x1xi32>
    %370 = vector.shape_cast %369 : vector<8x1xi1> to vector<8x1xi1>
    %371 = vector.broadcast %370 : vector<8x1xi1> to vector<8x128xi1>
    %372 = arith.select %371, %367, %325 : vector<8x128xi1>, vector<8x128xf32>
    %373 = vector.shape_cast %369 : vector<8x1xi1> to vector<8x1xi1>
    %374 = vector.broadcast %373 : vector<8x1xi1> to vector<8x128xi1>
    %375 = arith.select %374, %365, %328 : vector<8x128xi1>, vector<8x128xf32>
    %cst_77 = arith.constant 0.000000e+00 : f32
    %376 = vector.shape_cast %369 : vector<8x1xi1> to vector<8x1xi1>
    %377 = vector.broadcast %376 : vector<8x1xi1> to vector<8x128xi1>
    %378 = vector.broadcast %cst_77 : f32 to vector<8x128xf32>
    %379 = arith.select %377, %367, %378 : vector<8x128xi1>, vector<8x128xf32>
    %380 = arith.index_cast %c7_i32 : i32 to index
    %c0_78 = arith.constant 0 : index
    %c0_79 = arith.constant 0 : index
    %381 = vector.load %arg6[%380, %c0_78, %c0_79] : memref<8x8x128xf32, #tpu.memory_space<vmem>>, vector<1x8x128xf32>
    %382 = vector.shape_cast %381 : vector<1x8x128xf32> to vector<8x128xf32>
    %383 = vector.shape_cast %379 : vector<8x128xf32> to vector<1x8x128xf32>
    tpu.vector_store %arg6[%380, %c0_78, %c0_79], %383 {strides = array<i32>} : memref<8x8x128xf32, #tpu.memory_space<vmem>>, vector<1x8x128xf32>,
    %c8_i32_80 = arith.constant 8 : i32
    %c0_81 = arith.constant 0 : index
    %c0_82 = arith.constant 0 : index
    %384 = vector.load %arg7[%c0_81, %c0_82] : memref<8x128xf32, #tpu.memory_space<vmem>>, vector<8x128xf32>
    tpu.vector_store %arg7[%c0_81, %c0_82], %372 {strides = array<i32>} : memref<8x128xf32, #tpu.memory_space<vmem>>, vector<8x128xf32>,
    %c0_83 = arith.constant 0 : index
    %c0_84 = arith.constant 0 : index
    %385 = vector.load %arg8[%c0_83, %c0_84] : memref<8x128xf32, #tpu.memory_space<vmem>>, vector<8x128xf32>
    tpu.vector_store %arg8[%c0_83, %c0_84], %375 {strides = array<i32>} : memref<8x128xf32, #tpu.memory_space<vmem>>, vector<8x128xf32>,
    return
  }
  func.func @transform_0(%arg0: i32) -> (i32, i32, i32) {
    %c0_i32 = arith.constant 0 : i32
    %c0_i32_0 = arith.constant 0 : i32
    %c0_i32_1 = arith.constant 0 : i32
    return %arg0, %c0_i32, %c0_i32_0 : i32, i32, i32
  }
  func.func @transform_1(%arg0: i32) -> (i32, i32) {
    %c0_i32 = arith.constant 0 : i32
    %c0_i32_0 = arith.constant 0 : i32
    %c0_i32_1 = arith.constant 0 : i32
    return %c0_i32, %c0_i32_0 : i32, i32
  }
  func.func @transform_2(%arg0: i32) -> (i32, i32) {
    %c0_i32 = arith.constant 0 : i32
    %c0_i32_0 = arith.constant 0 : i32
    %c0_i32_1 = arith.constant 0 : i32
    return %c0_i32, %c0_i32_0 : i32, i32
  }
  func.func @transform_3(%arg0: i32) -> (i32, i32) {
    %c0_i32 = arith.constant 0 : i32
    %c0_i32_0 = arith.constant 0 : i32
    %c0_i32_1 = arith.constant 0 : i32
    return %c0_i32, %c0_i32_0 : i32, i32
  }
  func.func @transform_4(%arg0: i32) -> (i32, i32) {
    %c0_i32 = arith.constant 0 : i32
    %c0_i32_0 = arith.constant 0 : i32
    %c0_i32_1 = arith.constant 0 : i32
    return %c0_i32, %c0_i32_0 : i32, i32
  }
  func.func @transform_5(%arg0: i32) -> (i32, i32, i32) {
    %c0_i32 = arith.constant 0 : i32
    %c0_i32_0 = arith.constant 0 : i32
    %c0_i32_1 = arith.constant 0 : i32
    return %arg0, %c0_i32, %c0_i32_0 : i32, i32, i32
  }
  func.func @transform_6(%arg0: i32) -> (i32, i32) {
    %c0_i32 = arith.constant 0 : i32
    %c0_i32_0 = arith.constant 0 : i32
    %c0_i32_1 = arith.constant 0 : i32
    return %c0_i32, %c0_i32_0 : i32, i32
  }
  func.func @transform_7(%arg0: i32) -> (i32, i32) {
    %c0_i32 = arith.constant 0 : i32
    %c0_i32_0 = arith.constant 0 : i32
    %c0_i32_1 = arith.constant 0 : i32
    return %c0_i32, %c0_i32_0 : i32, i32
  }
}

</mosaic_0001>

<bundles_post_ra>
// kernel: tpu_custom_call.1
= control target key start
LH: loop header
LB: loop body
LE: loop exit
PB: predicated region body
PF: predicated region fallthrough
CT: control target
= control target key end

     0   :  { %13 = vsyncpa [#allocation3], 0  ;;  %s3024_s0 = inlined_call_operand.hbm [shape: f32[8,8,512], index: 0, kind: input, shape index: {}]   ;;  %s3025_s1 = inlined_call_operand.hbm [shape: f32[128,512], index: 1, kind: input, shape index: {}]   ;;  %s3026_s2 = inlined_call_operand.vmem [shape: s32[8,1], index: 2, kind: input, shape index: {}]   ;;  %s3027_s3 = inlined_call_operand.vmem [shape: f32[8,128], index: 3, kind: input, shape index: {}]   ;;  %s3028_s4 = inlined_call_operand.vmem [shape: f32[8,128], index: 4, kind: input, shape index: {}]   ;;  %s3029_s5 = inlined_call_operand.hbm [shape: f32[8,8,128], index: 5, kind: output, shape index: {0}]   ;;  %s3030_s6 = inlined_call_operand.hbm [shape: f32[8,128], index: 6, kind: output, shape index: {1}]   ;;  %s3031_s7 = inlined_call_operand.hbm [shape: f32[8,128], index: 7, kind: output, shape index: {2}]  }
   0x1   :  { %14 = vsyncpa [#allocation6], 0 }
   0x2   :  { %15 = vsyncpa [#allocation4], 0 }
   0x3   :  { %16 = vsyncpa [#allocation9], 0  ;;  %s2472_s24 = smov [#allocation2]   ;;  %s2354_s28 = scalar_lea.hbm %s3024_s0, 4096 }
   0x4   :  { %s22_s25 = sshll.u32 %s2472_s24, 4  ;;  %p2355_p0 = scmp.ne.s32.totalorder %s3024_s0, %s2354_s28  ;;  %s23_s25 = int_to_ptr.vmem [resolvable:$true] %s22_s25 }
   0x5   :  { %p2358_p1 = scmp.lt.u32.totalorder %s2354_s28, %s3024_s0 }
   0x7   :  { %p2360_p2 = pnand %p2358_p1, %p2355_p0 }
   0x9   :  { %2363 = shalt.err (!%p2360_p2)
}
   0xa   :  { %s2364_s10 = scalar_lea.vmem %s23_s25, 4096  ;;  %p2369_p4 = scmp.lt.s32.totalorder %s23_s25, %s23_s25 }
   0xb   :  { %p2365_p3 = scmp.ne.s32.totalorder %s23_s25, %s2364_s10  ;;  %p2370_p5 = scmp.lt.s32.totalorder %s2364_s10, %s2364_s10 }
   0xd   :  { %p2371_p6 = por %p2370_p5, %p2369_p4 }
   0xf   :  { %p2372_p7 = pnand %p2371_p6, %p2365_p3 }
  0x11   :  { %2375 = shalt.err (!%p2372_p7)
}
  0x12   :  { %s2473_s11 = smov 512   ;;  %s2474_s12 = smov 32  }
  0x13   :  { %28 = dma.hbm_to_vmem [thread:$0]  %s3024_s0, 4096, %s23_s25, [#allocation3], %s2473_s11, %s2473_s11, %s2474_s12  }
  0x14   :  { %s2475_s15 = smov [#allocation5]   ;;  %s2376_s19 = scalar_lea.hbm %s3025_s1, 8192 }
  0x15   :  { %s34_s16 = sshll.u32 %s2475_s15, 4  ;;  %p2377_p8 = scmp.ne.s32.totalorder %s3025_s1, %s2376_s19  ;;  %s35_s16 = int_to_ptr.vmem [resolvable:$true] %s34_s16 }
  0x16   :  { %p2380_p9 = scmp.lt.u32.totalorder %s2376_s19, %s3025_s1 }
  0x18   :  { %p2382_p10 = pnand %p2380_p9, %p2377_p8 }
  0x1a   :  { %2385 = shalt.err (!%p2382_p10)
}
  0x1b   :  { %s2386_s24 = scalar_lea.vmem %s35_s16, 8192  ;;  %p2391_p12 = scmp.lt.s32.totalorder %s35_s16, %s35_s16 }
  0x1c   :  { %p2387_p11 = scmp.ne.s32.totalorder %s35_s16, %s2386_s24  ;;  %p2392_p13 = scmp.lt.s32.totalorder %s2386_s24, %s2386_s24 }
  0x1e   :  { %p2393_p0 = por %p2392_p13, %p2391_p12 }
  0x20   :  { %p2394_p1 = pnand %p2393_p0, %p2387_p11 }
  0x22   :  { %2397 = shalt.err (!%p2394_p1)
}
  0x23   :  { %40 = dma.hbm_to_vmem [thread:$0]  %s3025_s1, 8192, %s35_s16, [#allocation6], %s2473_s11, %s2473_s11, %s2474_s12  }
  0x24   :  { %2464 = dma.done.wait [#allocation3], 4096  }
  0x25   :  { %2465 = vsyncadd [#allocation3], 4294963200 }
  0x26   :  { %2466 = dma.done.wait [#allocation6], 8192  }
  0x27   :  { %2467 = vsyncadd [#allocation6], 4294959104  ;;  %v2476_v0 = vmov 0.0   ;;  %v2477_v1 = vmov 0   ;;  %v62_v2 = vld [vmem:[#allocation5 + $0x8] sm:$0xff]  ;;  %v61_v4 = vld [vmem:[#allocation5] sm:$0xff] }
  0x28   :  { %197 = vmatprep.mubr.f32.mxu0 %v2476_v0  ;;  %268 = vmatprep.mubr.f32.mxu1 %v2476_v0  ;;  %v66_v3 = vld [vmem:[#allocation5 + $0x28] sm:$0xff]  ;;  %v65_v6 = vld [vmem:[#allocation5 + $0x20] sm:$0xff]  ;;  %v64_v20 = vld [vmem:[#allocation5 + $0x18] sm:$0xff]  ;;  %s2479_s30 = smov [#allocation7]   ;;  %s2480_s9 = smov [#allocation10]  }
  0x29   :  { %2224 = vset.pattern.permute.xlu0 %v2477_v1  ;;  %2225 = vset.pattern.permute.xlu1 %v2477_v1  ;;  %v2551_v5 = vpack.c.bf16 %v66_v3, %v62_v2  ;;  %v70_v7 = vld [vmem:[#allocation5 + $0x48] sm:$0xff]  ;;  %v2553_v9 = vpack.c.bf16 %v65_v6, %v61_v4  ;;  %v69_v11 = vld [vmem:[#allocation5 + $0x40] sm:$0xff]  ;;  %v68_v21 = vld [vmem:[#allocation5 + $0x38] sm:$0xff]  ;;  %s1637_s8 = sshll.u32 %s2479_s30, 4  ;;  %s1660_s10 = sshll.u32 %s2480_s9, 4  ;;  %s2972_s8 = int_to_ptr.vmem [resolvable:$true] %s1637_s8  ;;  %s2976_s10 = int_to_ptr.vmem [resolvable:$true] %s1660_s10 }
  0x2a   :  { %v74_v8 = vld [vmem:[#allocation5 + $0x68] sm:$0xff]  ;;  %v73_v12 = vld [vmem:[#allocation5 + $0x60] sm:$0xff]  ;;  %v2564_v23 = vpack.c.bf16 %v68_v21, %v64_v20  ;;  %v63_v24 = vld [vmem:[#allocation5 + $0x10] sm:$0xff] }
  0x2b   :  { %v2555_v10 = vpack.c.bf16 %v74_v8, %v70_v7  ;;  %v78_v13 = vld [vmem:[#allocation5 + $0x88] sm:$0xff]  ;;  %1702 = vmatprep.subr.bf16.mxu0 %v2551_v5  ;;  %v2559_v15 = vpack.c.bf16 %v73_v12, %v69_v11  ;;  %v77_v16 = vld [vmem:[#allocation5 + $0x80] sm:$0xff]  ;;  %v67_v25 = vld [vmem:[#allocation5 + $0x30] sm:$0xff] }
  0x2c   :  { %v82_v14 = vld [vmem:[#allocation5 + $0xa8] sm:$0xff]  ;;  %1704 = vmatpush1.bf16.msra.mxu0 %v2553_v9  ;;  %v81_v17 = vld [vmem:[#allocation5 + $0xa0] sm:$0xff]  ;;  %v2566_v26 = vpack.c.bf16 %v67_v25, %v63_v24  ;;  %1734 = vmatprep.subr.bf16.mxu1 %v2564_v23  ;;  %v72_v28 = vld [vmem:[#allocation5 + $0x58] sm:$0xff] }
  0x2d   :  { %1706 = vmatprep.subr.bf16.mxu0 %v2555_v10  ;;  %v2562_v18 = vpack.c.bf16 %v82_v14, %v78_v13  ;;  %v86_v19 = vld [vmem:[#allocation5 + $0xc8] sm:$0xff]  ;;  %v2569_v27 = vpack.c.bf16 %v81_v17, %v77_v16  ;;  %v76_v29 = vld [vmem:[#allocation5 + $0x78] sm:$0xff]  ;;  %v71_v30 = vld [vmem:[#allocation5 + $0x50] sm:$0xff] }
  0x2e   :  { %v90_v22 = vld [vmem:[#allocation5 + $0xe8] sm:$0xff]  ;;  %v85_v32 = vld [vmem:[#allocation5 + $0xc0] sm:$0xff]  ;;  %1736 = vmatpush1.bf16.msra.mxu1 %v2566_v26  ;;  %v2576_v34 = vpack.c.bf16 %v76_v29, %v72_v28  ;;  %v75_v35 = vld [vmem:[#allocation5 + $0x70] sm:$0xff] }
  0x2f   :  { %v2573_v31 = vpack.c.bf16 %v90_v22, %v86_v19  ;;  %v89_v33 = vld [vmem:[#allocation5 + $0xe0] sm:$0xff]  ;;  %v94_v36 = vld [vmem:[#allocation5 + $0x108] sm:$0xff]  ;;  %v2578_v38 = vpack.c.bf16 %v75_v35, %v71_v30  ;;  %v80_v39 = vld [vmem:[#allocation5 + $0x98] sm:$0xff] }
  0x30   :  { %1708 = vmatpush1.bf16.msra.mxu0 %v2559_v15  ;;  %v98_v37 = vld [vmem:[#allocation5 + $0x128] sm:$0xff]  ;;  %1738 = vmatprep.subr.bf16.mxu1 %v2576_v34  ;;  %v84_v40 = vld [vmem:[#allocation5 + $0xb8] sm:$0xff]  ;;  %v79_v41 = vld [vmem:[#allocation5 + $0x90] sm:$0xff]  ;;  %v2582_v43 = vpack.c.bf16 %v89_v33, %v85_v32 }
  0x31   :  { %1710 = vmatprep.subr.bf16.mxu0 %v2562_v18  ;;  %v83_v42 = vld [vmem:[#allocation5 + $0xb0] sm:$0xff]  ;;  %v93_v44 = vld [vmem:[#allocation5 + $0x100] sm:$0xff]  ;;  %v2584_v46 = vpack.c.bf16 %v84_v40, %v80_v39  ;;  %v2587_v47 = vpack.c.bf16 %v98_v37, %v94_v36  ;;  %v102_v48 = vld [vmem:[#allocation5 + $0x148] sm:$0xff] }
  0x32   :  { %v97_v45 = vld [vmem:[#allocation5 + $0x120] sm:$0xff]  ;;  %1740 = vmatpush1.bf16.msra.mxu1 %v2578_v38  ;;  %v2590_v49 = vpack.c.bf16 %v83_v42, %v79_v41  ;;  %v88_v50 = vld [vmem:[#allocation5 + $0xd8] sm:$0xff]  ;;  %v106_v52 = vld [vmem:[#allocation5 + $0x168] sm:$0xff] }
  0x33   :  { %v92_v51 = vld [vmem:[#allocation5 + $0xf8] sm:$0xff]  ;;  %1742 = vmatprep.subr.bf16.mxu1 %v2584_v46  ;;  %v87_v54 = vld [vmem:[#allocation5 + $0xd0] sm:$0xff]  ;;  %v2596_v56 = vpack.c.bf16 %v97_v45, %v93_v44  ;;  %v2599_v59 = vpack.c.bf16 %v106_v52, %v102_v48  ;;  %v101_v60 = vld [vmem:[#allocation5 + $0x140] sm:$0xff] }
  0x34   :  { %1712 = vmatpush1.bf16.msra.mxu0 %v2569_v27  ;;  %v2593_v53 = vpack.c.bf16 %v92_v51, %v88_v50  ;;  %v91_v55 = vld [vmem:[#allocation5 + $0xf0] sm:$0xff]  ;;  %v96_v57 = vld [vmem:[#allocation5 + $0x118] sm:$0xff]  ;;  %v105_v61 = vld [vmem:[#allocation5 + $0x160] sm:$0xff] }
  0x35   :  { %1714 = vmatprep.subr.bf16.mxu0 %v2573_v31  ;;  %v100_v58 = vld [vmem:[#allocation5 + $0x138] sm:$0xff]  ;;  %v110_v62 = vld [vmem:[#allocation5 + $0x188] sm:$0xff]  ;;  %v2602_v63 = vpack.c.bf16 %v91_v55, %v87_v54  ;;  %v95_v4 = vld [vmem:[#allocation5 + $0x110] sm:$0xff]  ;;  %v2608_v11 = vpack.c.bf16 %v105_v61, %v101_v60 }
  0x36   :  { %1744 = vmatpush1.bf16.msra.mxu1 %v2590_v49  ;;  %v114_v2 = vld [vmem:[#allocation5 + $0x1a8] sm:$0xff]  ;;  %v2605_v3 = vpack.c.bf16 %v100_v58, %v96_v57  ;;  %v99_v6 = vld [vmem:[#allocation5 + $0x130] sm:$0xff]  ;;  %v104_v7 = vld [vmem:[#allocation5 + $0x158] sm:$0xff] }
  0x37   :  { %1746 = vmatprep.subr.bf16.mxu1 %v2593_v53  ;;  %v108_v8 = vld [vmem:[#allocation5 + $0x178] sm:$0xff]  ;;  %v109_v12 = vld [vmem:[#allocation5 + $0x180] sm:$0xff]  ;;  %v2611_v13 = vpack.c.bf16 %v114_v2, %v110_v62  ;;  %v118_v16 = vld [vmem:[#allocation5 + $0x1c8] sm:$0xff]  ;;  %v2614_v17 = vpack.c.bf16 %v99_v6, %v95_v4 }
  0x38   :  { %1716 = vmatpush1.bf16.msra.mxu0 %v2582_v43  ;;  %v113_v14 = vld [vmem:[#allocation5 + $0x1a0] sm:$0xff]  ;;  %v122_v20 = vld [vmem:[#allocation5 + $0x1e8] sm:$0xff]  ;;  %v2622_v21 = vpack.c.bf16 %v108_v8, %v104_v7  ;;  %v103_v22 = vld [vmem:[#allocation5 + $0x150] sm:$0xff] }
  0x39   :  { %1718 = vmatprep.subr.bf16.mxu0 %v2587_v47  ;;  %v2619_v19 = vld [vmem:[%s3026_s2] sm:$0xff]  ;;  %v107_v24 = vld [vmem:[#allocation5 + $0x170] sm:$0xff]  ;;  %v112_v25 = vld [vmem:[#allocation5 + $0x198] sm:$0xff]  ;;  %v2628_v30 = vpack.c.bf16 %v113_v14, %v109_v12  ;;  %v2631_v32 = vpack.c.bf16 %v122_v20, %v118_v16 }
  0x3a   :  { %1748 = vmatpush1.bf16.msra.mxu1 %v2602_v63  ;;  %vm304_vm0 = vcmp.gt.s32.totalorder %v2619_v19, 0  ;;  %vm491_vm1 = vcmp.gt.s32.totalorder %v2619_v19, 1  ;;  %v116_v28 = vld [vmem:[#allocation5 + $0x1b8] sm:$0xff]  ;;  %v117_v33 = vld [vmem:[#allocation5 + $0x1c0] sm:$0xff]  ;;  %v2634_v36 = vpack.c.bf16 %v107_v24, %v103_v22  ;;  %v111_v40 = vld [vmem:[#allocation5 + $0x190] sm:$0xff]  ;;  %vm1055_vm2 = vcmp.gt.s32.totalorder %v2619_v19, 4 }
  0x3b   :  { %1750 = vmatprep.subr.bf16.mxu1 %v2605_v3  ;;  %v305_v29 = vsel %vm304_vm0, 1, %v2477_v1  ;;  %v121_v35 = vld [vmem:[#allocation5 + $0x1e0] sm:$0xff]  ;;  %v492_v37 = vsel %vm491_vm1, 1, %v2477_v1  ;;  %v2638_v39 = vpack.c.bf16 %v116_v28, %v112_v25  ;;  %v115_v41 = vld [vmem:[#allocation5 + $0x1b0] sm:$0xff]  ;;  %v120_v42 = vld [vmem:[#allocation5 + $0x1d8] sm:$0xff]  ;;  %v1056_v50 = vsel %vm1055_vm2, 1, %v2477_v1 }
  0x3c   :  { %1720 = vmatpush1.bf16.msra.mxu0 %v2596_v56  ;;  %307 = vperm.xlu0 %2224, %v305_v29   ;;  %v124_v44 = vld [vmem:[#allocation5 + $0x1f8] sm:$0xff]  ;;  %v2642_v45 = vpack.c.bf16 %v121_v35, %v117_v33  ;;  %v2646_v48 = vpack.c.bf16 %v115_v41, %v111_v40  ;;  %v119_v52 = vld [vmem:[#allocation5 + $0x1d0] sm:$0xff]  ;;  %vm1431_vm3 = vcmp.gt.s32.totalorder %v2619_v19, 6  ;;  %v2657_v55 = vld [vmem:[%s3027_s3] sm:$0xff]  ;;  %vm679_vm5 = vcmp.gt.s32.totalorder %v2619_v19, 2 }
  0x3d   :  { %1722 = vmatprep.subr.bf16.mxu0 %v2599_v59  ;;  %v2650_v51 = vpack.c.bf16 %v124_v44, %v120_v42  ;;  %v123_v54 = vld [vmem:[#allocation5 + $0x1f0] sm:$0xff]  ;;  %v1432_v58 = vsel %vm1431_vm3, 1, %v2477_v1  ;;  %v129_v60 = vld [vmem:[#allocation2] sm:$0xff]  ;;  %v130_v61 = vld [vmem:[#allocation2 + $0x8] sm:$0xff]  ;;  %vm867_vm6 = vcmp.gt.s32.totalorder %v2619_v19, 3  ;;  %vm1243_vm7 = vcmp.gt.s32.totalorder %v2619_v19, 5 }
  0x3e   :  { %1752 = vmatpush1.bf16.msra.mxu1 %v2614_v17  ;;  %v2660_v57 = vpack.c.bf16 %v123_v54, %v119_v52  ;;  %v132_v12 = vld [vmem:[#allocation2 + $0x18] sm:$0xff]  ;;  %v131_v22 = vld [vmem:[#allocation2 + $0x10] sm:$0xff]  ;;  %v59_v41 = vld [vmem:[%s3028_s4] sm:$0xff]  ;;  %vm1619_vm8 = vcmp.gt.s32.totalorder %v2619_v19, 7  ;;  %s2478_s4 = smov [#allocation8]  }
  0x3f   :  { %1754 = vmatprep.subr.bf16.mxu1 %v2622_v21  ;;  %s1650_s29 = sshll.u32 %s2478_s4, 4  ;;  %s1651_s29 = int_to_ptr.vmem [resolvable:$true] %s1650_s29 }
  0x40   :  { %1724 = vmatpush1.bf16.msra.mxu0 %v2608_v11  ;;  %494 = vperm.xlu0 %2224, %v492_v37   ;;  %s2398_s11 = scalar_lea.vmem %s1651_s29, 128  ;;  %p2403_p3 = scmp.lt.s32.totalorder %s1651_s29, %s1651_s29 }
  0x41   :  { %1726 = vmatprep.subr.bf16.mxu0 %v2611_v13  ;;  %p2399_p2 = scmp.ne.s32.totalorder %s1651_s29, %s2398_s11  ;;  %p2404_p4 = scmp.lt.s32.totalorder %s2398_s11, %s2398_s11 }
  0x42   :  { %1756 = vmatpush1.bf16.msra.mxu1 %v2634_v36 }
  0x43   :  { %1758 = vmatprep.subr.bf16.mxu1 %v2638_v39  ;;  %p2405_p5 = por %p2404_p4, %p2403_p3 }
  0x44   :  { %1728 = vmatpush1.bf16.msra.mxu0 %v2628_v30  ;;  %1058 = vperm.xlu0 %2224, %v1056_v50  }
  0x45   :  { %1730 = vmatprep.subr.bf16.mxu0 %v2631_v32  ;;  %p2406_p6 = pnand %p2405_p5, %p2399_p2 }
  0x46   :  { %1760 = vmatpush1.bf16.msra.mxu1 %v2646_v48 }
  0x47   :  { %1762 = vmatprep.subr.bf16.mxu1 %v2650_v51 }
  0x48   :  { %1732 = vmatpush1.bf16.msra.mxu0 %v2642_v45  ;;  %1434 = vperm.xlu0 %2224, %v1432_v58  }
  0x49   :  { %1766 = vmatprep.subr.bf16.mxu0 %v2551_v5 }
  0x4a   :  { %1764 = vmatpush1.bf16.msra.mxu1 %v2660_v57 }
  0x4b   :  { %198 = vmatmul.mubr.f32.vlgmr.msra.gmra.mrb[0].mxu0 %v2657_v55  ;;  %1798 = vmatprep.subr.bf16.mxu1 %v2564_v23 }
  0x4c   :  { %1768 = vmatpush1.bf16.msra.mxu0 %v2553_v9  ;;  %384 = vmatprep.mubr.f32.mxu0 %v2476_v0 }
  0x4d   :  { %1770 = vmatprep.subr.bf16.mxu0 %v2555_v10  ;;  %269 = vmatmul.mubr.f32.vlgmr.msra.gmra.mrb[0].mxu1 %v2657_v55 }
  0x4e   :  { %1800 = vmatpush1.bf16.msra.mxu1 %v2566_v26  ;;  %455 = vmatprep.mubr.f32.mxu1 %v2476_v0 }
  0x4f   :  { %1802 = vmatprep.subr.bf16.mxu1 %v2576_v34 }
  0x50   :  { %1772 = vmatpush1.bf16.msra.mxu0 %v2559_v15 }
  0x51   :  { %1774 = vmatprep.subr.bf16.mxu0 %v2562_v18 }
  0x52   :  { %1804 = vmatpush1.bf16.msra.mxu1 %v2578_v38 }
  0x53   :  { %1806 = vmatprep.subr.bf16.mxu1 %v2584_v46 }
  0x54   :  { %1776 = vmatpush1.bf16.msra.mxu0 %v2569_v27 }
  0x55   :  { %1778 = vmatprep.subr.bf16.mxu0 %v2573_v31 }
  0x56   :  { %1808 = vmatpush1.bf16.msra.mxu1 %v2590_v49 }
  0x57   :  { %1810 = vmatprep.subr.bf16.mxu1 %v2593_v53 }
  0x58   :  { %1780 = vmatpush1.bf16.msra.mxu0 %v2582_v43 }
  0x59   :  { %1782 = vmatprep.subr.bf16.mxu0 %v2587_v47 }
  0x5a   :  { %1812 = vmatpush1.bf16.msra.mxu1 %v2602_v63 }
  0x5b   :  { %1814 = vmatprep.subr.bf16.mxu1 %v2605_v3 }
  0x5c   :  { %1784 = vmatpush1.bf16.msra.mxu0 %v2596_v56 }
  0x5d   :  { %1786 = vmatprep.subr.bf16.mxu0 %v2599_v59 }
  0x5e   :  { %1816 = vmatpush1.bf16.msra.mxu1 %v2614_v17 }
  0x5f   :  { %1818 = vmatprep.subr.bf16.mxu1 %v2622_v21 }
  0x60   :  { %1788 = vmatpush1.bf16.msra.mxu0 %v2608_v11 }
  0x61   :  { %1790 = vmatprep.subr.bf16.mxu0 %v2611_v13 }
  0x62   :  { %1820 = vmatpush1.bf16.msra.mxu1 %v2634_v36 }
  0x63   :  { %1822 = vmatprep.subr.bf16.mxu1 %v2638_v39 }
  0x64   :  { %1792 = vmatpush1.bf16.msra.mxu0 %v2628_v30 }
  0x65   :  { %1794 = vmatprep.subr.bf16.mxu0 %v2631_v32 }
  0x66   :  { %1824 = vmatpush1.bf16.msra.mxu1 %v2646_v48 }
  0x67   :  { %1826 = vmatprep.subr.bf16.mxu1 %v2650_v51 }
  0x68   :  { %1796 = vmatpush1.bf16.msra.mxu0 %v2642_v45 }
  0x69   :  { %1830 = vmatprep.subr.bf16.mxu0 %v2551_v5 }
  0x6a   :  { %1828 = vmatpush1.bf16.msra.mxu1 %v2660_v57 }
  0x6b   :  { %1862 = vmatprep.subr.bf16.mxu1 %v2564_v23 }
  0xbb   :  { %v308_v50 = vpop.permute.xlu0 %307 }
  0xbc   :  { %vm309_vm4 = vcmp.eq.s32.totalorder %v308_v50, 1 }
 0x11e   :  { %v199_v62 = vpop.f32.mrb[0].mxu0 }
 0x11f   :  { %v275_v2 = vadd.f32 %v199_v62, %v129_v60  ;;  %v201_v4 = vpop.f32.mrb[1].mxu0 }
 0x120   :  { %v276_v6 = vadd.f32 %v201_v4, %v130_v61  ;;  %v270_v14 = vpop.f32.mrb[0].mxu1 }
 0x121   :  { %v1677_v7 = vmul.f32 -1.442695, %v275_v2  ;;  %v272_v16 = vpop.f32.mrb[1].mxu1  ;;  %v277_v25 = vadd.f32 %v270_v14, %v131_v22  ;;  %v1620_v14 = vsel %vm1619_vm8, 1, %v2477_v1 }
 0x122   :  { %v1678_v8 = vmul.f32 -1.442695, %v276_v6  ;;  %v278_v20 = vadd.f32 %v272_v16, %v132_v12  ;;  %v1244_v12 = vsel %vm1243_vm7, 1, %v2477_v1  ;;  %v316_v16 = vld [vmem:[#allocation2 + $0x20] sm:$0xff] }
 0x123   :  { %2226 = vpow2.f32 %v1677_v7 }
 0x124   :  { %2228 = vpow2.f32 %v1678_v8  ;;  %v1679_v24 = vmul.f32 -1.442695, %v278_v20  ;;  %v868_v8 = vsel %vm867_vm6, 1, %v2477_v1  ;;  %v317_v20 = vld [vmem:[#allocation2 + $0x28] sm:$0xff] }
 0x126   :  { %2230 = vpow2.f32 %v1679_v24 }
 0x127   :  { %2232 = vtanh.f32 %v277_v25 }
 0x12d   :  { %v2227_v28 = vpop.eup %2226 }
 0x12e   :  { %v2229_v29 = vpop.eup %2228  ;;  %v282_v33 = vadd.f32 1.0, %v2227_v28 }
 0x12f   :  { %v288_v35 = vadd.f32 1.0, %v2229_v29 }
 0x130   :  { %2234 = vrcp.f32 %v282_v33  ;;  %v2231_v37 = vpop.eup %2230 }
 0x131   :  { %2236 = vrcp.f32 %v288_v35  ;;  %v2233_v40 = vpop.eup %2232  ;;  %v295_v44 = vadd.f32 1.0, %v2231_v37 }
 0x133   :  { %2238 = vrcp.f32 %v295_v44 }
 0x13a   :  { %v2235_v42 = vpop.eup %2234 }
 0x13b   :  { %v2237_v52 = vpop.eup %2236  ;;  %v299_v54 = vmul.f32 %v2235_v42, %v2233_v40  ;;  %v319_v40 = vld [vmem:[#allocation2 + $0x38] sm:$0xff]  ;;  %v318_v42 = vld [vmem:[#allocation2 + $0x30] sm:$0xff] }
 0x13c   :  { %v298_v58 = vmul.f32 %v2237_v52, %v59_v41 }
 0x13d   :  { %v2239_v62 = vpop.eup %2238 }
 0x13e   :  { %v300_v60 = vadd.f32 %v299_v54, %v298_v58 }
 0x140   :  { %2240 = vtanh.f32 %v300_v60  ;;  %v2706_v61 = vsel %vm309_vm4, %v300_v60, %v59_v41 }
 0x14a   :  { %v2241_v2 = vpop.eup %2240 }
 0x14b   :  { %v302_v4 = vmul.f32 %v2241_v2, %v2239_v62 }
 0x14d   :  { %v2709_v6 = vsel %vm309_vm4, %v302_v4, %v2657_v55  ;;  %v312_v7 = vsel %vm309_vm4, %v302_v4, 0.0  ;;  %v680_v55 = vsel %vm679_vm5, 1, %v2477_v1 }
 0x14e   :  { %313 = vst [vmem:[#allocation7] sm:$0xff] %v312_v7  ;;  %385 = vmatmul.mubr.f32.vlgmr.msra.gmra.mrb[2].mxu0 %v2709_v6  ;;  %456 = vmatmul.mubr.f32.vlgmr.msra.gmra.mrb[2].mxu1 %v2709_v6 }
 0x14f   :  { %1832 = vmatpush1.bf16.msra.mxu0 %v2553_v9  ;;  %1864 = vmatpush1.bf16.msra.mxu1 %v2566_v26 }
 0x150   :  { %1834 = vmatprep.subr.bf16.mxu0 %v2555_v10  ;;  %1866 = vmatprep.subr.bf16.mxu1 %v2576_v34 }
 0x151   :  { %572 = vmatprep.mubr.f32.mxu0 %v2476_v0  ;;  %643 = vmatprep.mubr.f32.mxu1 %v2476_v0 }
 0x152   :  { %682 = vperm.xlu1 %2225, %v680_v55  }
 0x153   :  { %1836 = vmatpush1.bf16.msra.mxu0 %v2559_v15  ;;  %1868 = vmatpush1.bf16.msra.mxu1 %v2578_v38 }
 0x154   :  { %1838 = vmatprep.subr.bf16.mxu0 %v2562_v18  ;;  %1870 = vmatprep.subr.bf16.mxu1 %v2584_v46 }
 0x156   :  { %870 = vperm.xlu1 %2225, %v868_v8   ;;  %v495_v8 = vpop.permute.xlu0 %494 }
 0x157   :  { %1840 = vmatpush1.bf16.msra.mxu0 %v2569_v27  ;;  %1872 = vmatpush1.bf16.msra.mxu1 %v2590_v49  ;;  %vm496_vm9 = vcmp.eq.s32.totalorder %v495_v8, 1 }
 0x158   :  { %1842 = vmatprep.subr.bf16.mxu0 %v2573_v31  ;;  %1874 = vmatprep.subr.bf16.mxu1 %v2593_v53 }
 0x15a   :  { %1246 = vperm.xlu1 %2225, %v1244_v12  }
 0x15b   :  { %1844 = vmatpush1.bf16.msra.mxu0 %v2582_v43  ;;  %1876 = vmatpush1.bf16.msra.mxu1 %v2602_v63 }
 0x15c   :  { %1846 = vmatprep.subr.bf16.mxu0 %v2587_v47  ;;  %1878 = vmatprep.subr.bf16.mxu1 %v2605_v3 }
 0x15e   :  { %1622 = vperm.xlu1 %2225, %v1620_v14  }
 0x15f   :  { %1848 = vmatpush1.bf16.msra.mxu0 %v2596_v56  ;;  %1880 = vmatpush1.bf16.msra.mxu1 %v2614_v17 }
 0x160   :  { %1850 = vmatprep.subr.bf16.mxu0 %v2599_v59  ;;  %1882 = vmatprep.subr.bf16.mxu1 %v2622_v21 }
 0x163   :  { %1852 = vmatpush1.bf16.msra.mxu0 %v2608_v11  ;;  %1884 = vmatpush1.bf16.msra.mxu1 %v2634_v36 }
 0x164   :  { %1854 = vmatprep.subr.bf16.mxu0 %v2611_v13  ;;  %1886 = vmatprep.subr.bf16.mxu1 %v2638_v39 }
 0x167   :  { %1856 = vmatpush1.bf16.msra.mxu0 %v2628_v30  ;;  %1888 = vmatpush1.bf16.msra.mxu1 %v2646_v48 }
 0x168   :  { %1858 = vmatprep.subr.bf16.mxu0 %v2631_v32  ;;  %1890 = vmatprep.subr.bf16.mxu1 %v2650_v51 }
 0x16b   :  { %1860 = vmatpush1.bf16.msra.mxu0 %v2642_v45  ;;  %1892 = vmatpush1.bf16.msra.mxu1 %v2660_v57 }
 0x16c   :  { %1894 = vmatprep.subr.bf16.mxu0 %v2551_v5  ;;  %1926 = vmatprep.subr.bf16.mxu1 %v2564_v23 }
 0x221   :  { %v386_v22 = vpop.f32.mrb[2].mxu0  ;;  %v457_v24 = vpop.f32.mrb[2].mxu1 }
 0x222   :  { %v462_v25 = vadd.f32 %v386_v22, %v316_v16  ;;  %v388_v28 = vpop.f32.mrb[3].mxu0  ;;  %v459_v29 = vpop.f32.mrb[3].mxu1  ;;  %v464_v44 = vadd.f32 %v457_v24, %v318_v42 }
 0x223   :  { %v463_v33 = vadd.f32 %v388_v28, %v317_v20  ;;  %v465_v41 = vadd.f32 %v459_v29, %v319_v40 }
 0x224   :  { %v1680_v35 = vmul.f32 -1.442695, %v462_v25 }
 0x225   :  { %v1681_v37 = vmul.f32 -1.442695, %v463_v33  ;;  %v1682_v19 = vmul.f32 -1.442695, %v465_v41 }
 0x226   :  { %2242 = vpow2.f32 %v1680_v35 }
 0x227   :  { %2244 = vpow2.f32 %v1681_v37 }
 0x228   :  { %2246 = vpow2.f32 %v1682_v19  ;;  %v507_v19 = vld [vmem:[#allocation2 + $0x58] sm:$0xff] }
 0x229   :  { %2248 = vtanh.f32 %v464_v44 }
 0x230   :  { %v2243_v50 = vpop.eup %2242 }
 0x231   :  { %v2245_v1 = vpop.eup %2244  ;;  %v469_v52 = vadd.f32 1.0, %v2243_v50  ;;  %v506_v50 = vld [vmem:[#allocation2 + $0x50] sm:$0xff] }
 0x232   :  { %v475_v54 = vadd.f32 1.0, %v2245_v1  ;;  %v2247_v58 = vpop.eup %2246 }
 0x233   :  { %2250 = vrcp.f32 %v469_v52  ;;  %v2249_v60 = vpop.eup %2248  ;;  %v482_v7 = vadd.f32 1.0, %v2247_v58 }
 0x234   :  { %2252 = vrcp.f32 %v475_v54 }
 0x235   :  { %2254 = vrcp.f32 %v482_v7 }
 0x23d   :  { %v2251_v62 = vpop.eup %2250 }
 0x23e   :  { %v2253_v2 = vpop.eup %2252  ;;  %v486_v4 = vmul.f32 %v2251_v62, %v2249_v60 }
 0x23f   :  { %v485_v55 = vmul.f32 %v2253_v2, %v2706_v61  ;;  %v2255_v16 = vpop.eup %2254 }
 0x241   :  { %v487_v12 = vadd.f32 %v486_v4, %v485_v55  ;;  %v683_v55 = vpop.permute.xlu1 %682 }
 0x242   :  { %vm684_vm10 = vcmp.eq.s32.totalorder %v683_v55, 1 }
 0x243   :  { %2256 = vtanh.f32 %v487_v12  ;;  %v2757_v14 = vsel %vm496_vm9, %v487_v12, %v2706_v61  ;;  %v504_v61 = vld [vmem:[#allocation2 + $0x40] sm:$0xff] }
 0x24d   :  { %v2257_v20 = vpop.eup %2256 }
 0x24e   :  { %v489_v22 = vmul.f32 %v2257_v20, %v2255_v16 }
 0x250   :  { %v2760_v24 = vsel %vm496_vm9, %v489_v22, %v2709_v6  ;;  %v499_v25 = vsel %vm496_vm9, %v489_v22, 0.0  ;;  %v505_v6 = vld [vmem:[#allocation2 + $0x48] sm:$0xff] }
 0x251   :  { %501 = vst [vmem:[#allocation7 + $0x8] sm:$0xff] %v499_v25  ;;  %573 = vmatmul.mubr.f32.vlgmr.msra.gmra.mrb[4].mxu0 %v2760_v24  ;;  %644 = vmatmul.mubr.f32.vlgmr.msra.gmra.mrb[4].mxu1 %v2760_v24 }
 0x252   :  { %1896 = vmatpush1.bf16.msra.mxu0 %v2553_v9  ;;  %1928 = vmatpush1.bf16.msra.mxu1 %v2566_v26 }
 0x253   :  { %1898 = vmatprep.subr.bf16.mxu0 %v2555_v10  ;;  %1930 = vmatprep.subr.bf16.mxu1 %v2576_v34 }
 0x254   :  { %760 = vmatprep.mubr.f32.mxu0 %v2476_v0  ;;  %831 = vmatprep.mubr.f32.mxu1 %v2476_v0 }
 0x256   :  { %1900 = vmatpush1.bf16.msra.mxu0 %v2559_v15  ;;  %1932 = vmatpush1.bf16.msra.mxu1 %v2578_v38 }
 0x257   :  { %1902 = vmatprep.subr.bf16.mxu0 %v2562_v18  ;;  %1934 = vmatprep.subr.bf16.mxu1 %v2584_v46 }
 0x25a   :  { %1904 = vmatpush1.bf16.msra.mxu0 %v2569_v27  ;;  %1936 = vmatpush1.bf16.msra.mxu1 %v2590_v49 }
 0x25b   :  { %1906 = vmatprep.subr.bf16.mxu0 %v2573_v31  ;;  %1938 = vmatprep.subr.bf16.mxu1 %v2593_v53 }
 0x25e   :  { %1908 = vmatpush1.bf16.msra.mxu0 %v2582_v43  ;;  %1940 = vmatpush1.bf16.msra.mxu1 %v2602_v63 }
 0x25f   :  { %1910 = vmatprep.subr.bf16.mxu0 %v2587_v47  ;;  %1942 = vmatprep.subr.bf16.mxu1 %v2605_v3 }
 0x262   :  { %1912 = vmatpush1.bf16.msra.mxu0 %v2596_v56  ;;  %1944 = vmatpush1.bf16.msra.mxu1 %v2614_v17 }
 0x263   :  { %1914 = vmatprep.subr.bf16.mxu0 %v2599_v59  ;;  %1946 = vmatprep.subr.bf16.mxu1 %v2622_v21 }
 0x266   :  { %1916 = vmatpush1.bf16.msra.mxu0 %v2608_v11  ;;  %1948 = vmatpush1.bf16.msra.mxu1 %v2634_v36 }
 0x267   :  { %1918 = vmatprep.subr.bf16.mxu0 %v2611_v13  ;;  %1950 = vmatprep.subr.bf16.mxu1 %v2638_v39 }
 0x26a   :  { %1920 = vmatpush1.bf16.msra.mxu0 %v2628_v30  ;;  %1952 = vmatpush1.bf16.msra.mxu1 %v2646_v48 }
 0x26b   :  { %1922 = vmatprep.subr.bf16.mxu0 %v2631_v32  ;;  %1954 = vmatprep.subr.bf16.mxu1 %v2650_v51 }
 0x26e   :  { %1924 = vmatpush1.bf16.msra.mxu0 %v2642_v45  ;;  %1956 = vmatpush1.bf16.msra.mxu1 %v2660_v57 }
 0x26f   :  { %1958 = vmatprep.subr.bf16.mxu0 %v2551_v5  ;;  %1990 = vmatprep.subr.bf16.mxu1 %v2564_v23 }
 0x324   :  { %v574_v28 = vpop.f32.mrb[4].mxu0  ;;  %v645_v29 = vpop.f32.mrb[4].mxu1 }
 0x325   :  { %v650_v33 = vadd.f32 %v574_v28, %v504_v61  ;;  %v576_v35 = vpop.f32.mrb[5].mxu0  ;;  %v647_v37 = vpop.f32.mrb[5].mxu1  ;;  %v652_v52 = vadd.f32 %v645_v29, %v506_v50 }
 0x326   :  { %v651_v40 = vadd.f32 %v576_v35, %v505_v6  ;;  %v653_v44 = vadd.f32 %v647_v37, %v507_v19 }
 0x327   :  { %v1683_v41 = vmul.f32 -1.442695, %v650_v33 }
 0x328   :  { %v1684_v42 = vmul.f32 -1.442695, %v651_v40  ;;  %v1685_v1 = vmul.f32 -1.442695, %v653_v44 }
 0x329   :  { %2258 = vpow2.f32 %v1683_v41 }
 0x32a   :  { %2260 = vpow2.f32 %v1684_v42 }
 0x32b   :  { %2262 = vpow2.f32 %v1685_v1  ;;  %v695_v1 = vld [vmem:[#allocation2 + $0x78] sm:$0xff] }
 0x32c   :  { %2264 = vtanh.f32 %v652_v52 }
 0x333   :  { %v2259_v54 = vpop.eup %2258 }
 0x334   :  { %v2261_v58 = vpop.eup %2260  ;;  %v657_v60 = vadd.f32 1.0, %v2259_v54  ;;  %v694_v54 = vld [vmem:[#allocation2 + $0x70] sm:$0xff] }
 0x335   :  { %v663_v62 = vadd.f32 1.0, %v2261_v58  ;;  %v2263_v2 = vpop.eup %2262 }
 0x336   :  { %2266 = vrcp.f32 %v657_v60  ;;  %v2265_v4 = vpop.eup %2264  ;;  %v670_v12 = vadd.f32 1.0, %v2263_v2 }
 0x337   :  { %2268 = vrcp.f32 %v663_v62 }
 0x338   :  { %2270 = vrcp.f32 %v670_v12 }
 0x340   :  { %v2267_v7 = vpop.eup %2266 }
 0x341   :  { %v2269_v8 = vpop.eup %2268  ;;  %v674_v16 = vmul.f32 %v2267_v7, %v2265_v4 }
 0x342   :  { %v673_v20 = vmul.f32 %v2269_v8, %v2757_v14  ;;  %v2271_v61 = vpop.eup %2270 }
 0x344   :  { %v675_v22 = vadd.f32 %v674_v16, %v673_v20 }
 0x346   :  { %2272 = vtanh.f32 %v675_v22  ;;  %v2800_v25 = vsel %vm684_vm10, %v675_v22, %v2757_v14  ;;  %v692_v14 = vld [vmem:[#allocation2 + $0x60] sm:$0xff] }
 0x350   :  { %v2273_v6 = vpop.eup %2272 }
 0x351   :  { %v677_v28 = vmul.f32 %v2273_v6, %v2271_v61  ;;  %v871_v6 = vpop.permute.xlu1 %870 }
 0x352   :  { %vm872_vm11 = vcmp.eq.s32.totalorder %v871_v6, 1 }
 0x353   :  { %v2803_v29 = vsel %vm684_vm10, %v677_v28, %v2760_v24  ;;  %v687_v33 = vsel %vm684_vm10, %v677_v28, 0.0  ;;  %v693_v24 = vld [vmem:[#allocation2 + $0x68] sm:$0xff] }
 0x354   :  { %689 = vst [vmem:[#allocation7 + $0x10] sm:$0xff] %v687_v33  ;;  %761 = vmatmul.mubr.f32.vlgmr.msra.gmra.mrb[6].mxu0 %v2803_v29  ;;  %832 = vmatmul.mubr.f32.vlgmr.msra.gmra.mrb[6].mxu1 %v2803_v29 }
 0x355   :  { %1960 = vmatpush1.bf16.msra.mxu0 %v2553_v9  ;;  %1992 = vmatpush1.bf16.msra.mxu1 %v2566_v26 }
 0x356   :  { %1962 = vmatprep.subr.bf16.mxu0 %v2555_v10  ;;  %1994 = vmatprep.subr.bf16.mxu1 %v2576_v34 }
 0x357   :  { %948 = vmatprep.mubr.f32.mxu0 %v2476_v0  ;;  %1019 = vmatprep.mubr.f32.mxu1 %v2476_v0 }
 0x359   :  { %1964 = vmatpush1.bf16.msra.mxu0 %v2559_v15  ;;  %1996 = vmatpush1.bf16.msra.mxu1 %v2578_v38 }
 0x35a   :  { %1966 = vmatprep.subr.bf16.mxu0 %v2562_v18  ;;  %1998 = vmatprep.subr.bf16.mxu1 %v2584_v46 }
 0x35d   :  { %1968 = vmatpush1.bf16.msra.mxu0 %v2569_v27  ;;  %2000 = vmatpush1.bf16.msra.mxu1 %v2590_v49 }
 0x35e   :  { %1970 = vmatprep.subr.bf16.mxu0 %v2573_v31  ;;  %2002 = vmatprep.subr.bf16.mxu1 %v2593_v53 }
 0x361   :  { %1972 = vmatpush1.bf16.msra.mxu0 %v2582_v43  ;;  %2004 = vmatpush1.bf16.msra.mxu1 %v2602_v63 }
 0x362   :  { %1974 = vmatprep.subr.bf16.mxu0 %v2587_v47  ;;  %2006 = vmatprep.subr.bf16.mxu1 %v2605_v3 }
 0x365   :  { %1976 = vmatpush1.bf16.msra.mxu0 %v2596_v56  ;;  %2008 = vmatpush1.bf16.msra.mxu1 %v2614_v17 }
 0x366   :  { %1978 = vmatprep.subr.bf16.mxu0 %v2599_v59  ;;  %2010 = vmatprep.subr.bf16.mxu1 %v2622_v21 }
 0x369   :  { %1980 = vmatpush1.bf16.msra.mxu0 %v2608_v11  ;;  %2012 = vmatpush1.bf16.msra.mxu1 %v2634_v36 }
 0x36a   :  { %1982 = vmatprep.subr.bf16.mxu0 %v2611_v13  ;;  %2014 = vmatprep.subr.bf16.mxu1 %v2638_v39 }
 0x36d   :  { %1984 = vmatpush1.bf16.msra.mxu0 %v2628_v30  ;;  %2016 = vmatpush1.bf16.msra.mxu1 %v2646_v48 }
 0x36e   :  { %1986 = vmatprep.subr.bf16.mxu0 %v2631_v32  ;;  %2018 = vmatprep.subr.bf16.mxu1 %v2650_v51 }
 0x371   :  { %1988 = vmatpush1.bf16.msra.mxu0 %v2642_v45  ;;  %2020 = vmatpush1.bf16.msra.mxu1 %v2660_v57 }
 0x372   :  { %2022 = vmatprep.subr.bf16.mxu0 %v2551_v5  ;;  %2054 = vmatprep.subr.bf16.mxu1 %v2564_v23 }
 0x427   :  { %v762_v35 = vpop.f32.mrb[6].mxu0  ;;  %v833_v37 = vpop.f32.mrb[6].mxu1 }
 0x428   :  { %v838_v40 = vadd.f32 %v762_v35, %v692_v14  ;;  %v764_v41 = vpop.f32.mrb[7].mxu0  ;;  %v835_v42 = vpop.f32.mrb[7].mxu1  ;;  %v840_v60 = vadd.f32 %v833_v37, %v694_v54 }
 0x429   :  { %v839_v19 = vadd.f32 %v764_v41, %v693_v24  ;;  %v841_v52 = vadd.f32 %v835_v42, %v695_v1 }
 0x42a   :  { %v1686_v44 = vmul.f32 -1.442695, %v838_v40 }
 0x42b   :  { %v1687_v50 = vmul.f32 -1.442695, %v839_v19  ;;  %v1688_v58 = vmul.f32 -1.442695, %v841_v52 }
 0x42c   :  { %2274 = vpow2.f32 %v1686_v44 }
 0x42d   :  { %2276 = vpow2.f32 %v1687_v50 }
 0x42e   :  { %2278 = vpow2.f32 %v1688_v58  ;;  %v883_v58 = vld [vmem:[#allocation2 + $0x98] sm:$0xff] }
 0x42f   :  { %2280 = vtanh.f32 %v840_v60 }
 0x436   :  { %v2275_v62 = vpop.eup %2274 }
 0x437   :  { %v2277_v2 = vpop.eup %2276  ;;  %v845_v4 = vadd.f32 1.0, %v2275_v62  ;;  %v882_v62 = vld [vmem:[#allocation2 + $0x90] sm:$0xff] }
 0x438   :  { %v851_v7 = vadd.f32 1.0, %v2277_v2  ;;  %v2279_v55 = vpop.eup %2278 }
 0x439   :  { %2282 = vrcp.f32 %v845_v4  ;;  %v2281_v8 = vpop.eup %2280  ;;  %v858_v22 = vadd.f32 1.0, %v2279_v55 }
 0x43a   :  { %2284 = vrcp.f32 %v851_v7 }
 0x43b   :  { %2286 = vrcp.f32 %v858_v22 }
 0x443   :  { %v2283_v12 = vpop.eup %2282 }
 0x444   :  { %v2285_v16 = vpop.eup %2284  ;;  %v862_v20 = vmul.f32 %v2283_v12, %v2281_v8 }
 0x445   :  { %v861_v61 = vmul.f32 %v2285_v16, %v2800_v25  ;;  %v2287_v14 = vpop.eup %2286 }
 0x447   :  { %v863_v28 = vadd.f32 %v862_v20, %v861_v61 }
 0x449   :  { %2288 = vtanh.f32 %v863_v28  ;;  %v2843_v33 = vsel %vm872_vm11, %v863_v28, %v2800_v25  ;;  %v880_v25 = vld [vmem:[#allocation2 + $0x80] sm:$0xff] }
 0x453   :  { %v2289_v24 = vpop.eup %2288 }
 0x454   :  { %v865_v35 = vmul.f32 %v2289_v24, %v2287_v14  ;;  %v1059_v24 = vpop.permute.xlu0 %1058 }
 0x455   :  { %vm1060_vm12 = vcmp.eq.s32.totalorder %v1059_v24, 1 }
 0x456   :  { %v2846_v37 = vsel %vm872_vm11, %v865_v35, %v2803_v29  ;;  %v875_v40 = vsel %vm872_vm11, %v865_v35, 0.0  ;;  %v881_v29 = vld [vmem:[#allocation2 + $0x88] sm:$0xff] }
 0x457   :  { %877 = vst [vmem:[#allocation7 + $0x18] sm:$0xff] %v875_v40  ;;  %949 = vmatmul.mubr.f32.vlgmr.msra.gmra.mrb[8].mxu0 %v2846_v37  ;;  %1020 = vmatmul.mubr.f32.vlgmr.msra.gmra.mrb[8].mxu1 %v2846_v37 }
 0x458   :  { %2024 = vmatpush1.bf16.msra.mxu0 %v2553_v9  ;;  %2056 = vmatpush1.bf16.msra.mxu1 %v2566_v26 }
 0x459   :  { %2026 = vmatprep.subr.bf16.mxu0 %v2555_v10  ;;  %2058 = vmatprep.subr.bf16.mxu1 %v2576_v34 }
 0x45a   :  { %1136 = vmatprep.mubr.f32.mxu0 %v2476_v0  ;;  %1207 = vmatprep.mubr.f32.mxu1 %v2476_v0 }
 0x45c   :  { %2028 = vmatpush1.bf16.msra.mxu0 %v2559_v15  ;;  %2060 = vmatpush1.bf16.msra.mxu1 %v2578_v38 }
 0x45d   :  { %2030 = vmatprep.subr.bf16.mxu0 %v2562_v18  ;;  %2062 = vmatprep.subr.bf16.mxu1 %v2584_v46 }
 0x460   :  { %2032 = vmatpush1.bf16.msra.mxu0 %v2569_v27  ;;  %2064 = vmatpush1.bf16.msra.mxu1 %v2590_v49 }
 0x461   :  { %2034 = vmatprep.subr.bf16.mxu0 %v2573_v31  ;;  %2066 = vmatprep.subr.bf16.mxu1 %v2593_v53 }
 0x464   :  { %2036 = vmatpush1.bf16.msra.mxu0 %v2582_v43  ;;  %2068 = vmatpush1.bf16.msra.mxu1 %v2602_v63 }
 0x465   :  { %2038 = vmatprep.subr.bf16.mxu0 %v2587_v47  ;;  %2070 = vmatprep.subr.bf16.mxu1 %v2605_v3 }
 0x468   :  { %2040 = vmatpush1.bf16.msra.mxu0 %v2596_v56  ;;  %2072 = vmatpush1.bf16.msra.mxu1 %v2614_v17 }
 0x469   :  { %2042 = vmatprep.subr.bf16.mxu0 %v2599_v59  ;;  %2074 = vmatprep.subr.bf16.mxu1 %v2622_v21 }
 0x46c   :  { %2044 = vmatpush1.bf16.msra.mxu0 %v2608_v11  ;;  %2076 = vmatpush1.bf16.msra.mxu1 %v2634_v36 }
 0x46d   :  { %2046 = vmatprep.subr.bf16.mxu0 %v2611_v13  ;;  %2078 = vmatprep.subr.bf16.mxu1 %v2638_v39 }
 0x470   :  { %2048 = vmatpush1.bf16.msra.mxu0 %v2628_v30  ;;  %2080 = vmatpush1.bf16.msra.mxu1 %v2646_v48 }
 0x471   :  { %2050 = vmatprep.subr.bf16.mxu0 %v2631_v32  ;;  %2082 = vmatprep.subr.bf16.mxu1 %v2650_v51 }
 0x474   :  { %2052 = vmatpush1.bf16.msra.mxu0 %v2642_v45  ;;  %2084 = vmatpush1.bf16.msra.mxu1 %v2660_v57 }
 0x475   :  { %2086 = vmatprep.subr.bf16.mxu0 %v2551_v5  ;;  %2118 = vmatprep.subr.bf16.mxu1 %v2564_v23 }
 0x52a   :  { %v950_v41 = vpop.f32.mrb[8].mxu0  ;;  %v1021_v42 = vpop.f32.mrb[8].mxu1 }
 0x52b   :  { %v1026_v19 = vadd.f32 %v950_v41, %v880_v25  ;;  %v952_v44 = vpop.f32.mrb[9].mxu0  ;;  %v1023_v50 = vpop.f32.mrb[9].mxu1  ;;  %v1028_v4 = vadd.f32 %v1021_v42, %v882_v62 }
 0x52c   :  { %v1027_v1 = vadd.f32 %v952_v44, %v881_v29  ;;  %v1029_v60 = vadd.f32 %v1023_v50, %v883_v58 }
 0x52d   :  { %v1689_v52 = vmul.f32 -1.442695, %v1026_v19 }
 0x52e   :  { %v1690_v54 = vmul.f32 -1.442695, %v1027_v1  ;;  %v1691_v2 = vmul.f32 -1.442695, %v1029_v60 }
 0x52f   :  { %2290 = vpow2.f32 %v1689_v52 }
 0x530   :  { %2292 = vpow2.f32 %v1690_v54 }
 0x531   :  { %2294 = vpow2.f32 %v1691_v2  ;;  %v1071_v2 = vld [vmem:[#allocation2 + $0xb8] sm:$0xff] }
 0x532   :  { %2296 = vtanh.f32 %v1028_v4 }
 0x539   :  { %v2291_v7 = vpop.eup %2290 }
 0x53a   :  { %v2293_v55 = vpop.eup %2292  ;;  %v1033_v8 = vadd.f32 1.0, %v2291_v7  ;;  %v1070_v7 = vld [vmem:[#allocation2 + $0xb0] sm:$0xff] }
 0x53b   :  { %v1039_v12 = vadd.f32 1.0, %v2293_v55  ;;  %v2295_v16 = vpop.eup %2294 }
 0x53c   :  { %2298 = vrcp.f32 %v1033_v8  ;;  %v2297_v20 = vpop.eup %2296  ;;  %v1046_v28 = vadd.f32 1.0, %v2295_v16 }
 0x53d   :  { %2300 = vrcp.f32 %v1039_v12 }
 0x53e   :  { %2302 = vrcp.f32 %v1046_v28 }
 0x546   :  { %v2299_v22 = vpop.eup %2298 }
 0x547   :  { %v2301_v61 = vpop.eup %2300  ;;  %v1050_v6 = vmul.f32 %v2299_v22, %v2297_v20 }
 0x548   :  { %v1049_v14 = vmul.f32 %v2301_v61, %v2843_v33  ;;  %v2303_v25 = vpop.eup %2302 }
 0x54a   :  { %v1051_v35 = vadd.f32 %v1050_v6, %v1049_v14 }
 0x54c   :  { %2304 = vtanh.f32 %v1051_v35  ;;  %v2886_v40 = vsel %vm1060_vm12, %v1051_v35, %v2843_v33  ;;  %v1068_v33 = vld [vmem:[#allocation2 + $0xa0] sm:$0xff]  ;;  %v1247_v35 = vpop.permute.xlu1 %1246 }
 0x54d   :  { %vm1248_vm13 = vcmp.eq.s32.totalorder %v1247_v35, 1 }
 0x556   :  { %v2305_v29 = vpop.eup %2304 }
 0x557   :  { %v1053_v41 = vmul.f32 %v2305_v29, %v2303_v25 }
 0x559   :  { %v2889_v42 = vsel %vm1060_vm12, %v1053_v41, %v2846_v37  ;;  %v1063_v19 = vsel %vm1060_vm12, %v1053_v41, 0.0  ;;  %v1069_v37 = vld [vmem:[#allocation2 + $0xa8] sm:$0xff] }
 0x55a   :  { %1065 = vst [vmem:[#allocation7 + $0x20] sm:$0xff] %v1063_v19  ;;  %1137 = vmatmul.mubr.f32.vlgmr.msra.gmra.mrb[10].mxu0 %v2889_v42  ;;  %1208 = vmatmul.mubr.f32.vlgmr.msra.gmra.mrb[10].mxu1 %v2889_v42 }
 0x55b   :  { %2088 = vmatpush1.bf16.msra.mxu0 %v2553_v9  ;;  %2120 = vmatpush1.bf16.msra.mxu1 %v2566_v26 }
 0x55c   :  { %2090 = vmatprep.subr.bf16.mxu0 %v2555_v10  ;;  %2122 = vmatprep.subr.bf16.mxu1 %v2576_v34 }
 0x55d   :  { %1324 = vmatprep.mubr.f32.mxu0 %v2476_v0  ;;  %1395 = vmatprep.mubr.f32.mxu1 %v2476_v0 }
 0x55f   :  { %2092 = vmatpush1.bf16.msra.mxu0 %v2559_v15  ;;  %2124 = vmatpush1.bf16.msra.mxu1 %v2578_v38 }
 0x560   :  { %2094 = vmatprep.subr.bf16.mxu0 %v2562_v18  ;;  %2126 = vmatprep.subr.bf16.mxu1 %v2584_v46 }
 0x563   :  { %2096 = vmatpush1.bf16.msra.mxu0 %v2569_v27  ;;  %2128 = vmatpush1.bf16.msra.mxu1 %v2590_v49 }
 0x564   :  { %2098 = vmatprep.subr.bf16.mxu0 %v2573_v31  ;;  %2130 = vmatprep.subr.bf16.mxu1 %v2593_v53 }
 0x567   :  { %2100 = vmatpush1.bf16.msra.mxu0 %v2582_v43  ;;  %2132 = vmatpush1.bf16.msra.mxu1 %v2602_v63 }
 0x568   :  { %2102 = vmatprep.subr.bf16.mxu0 %v2587_v47  ;;  %2134 = vmatprep.subr.bf16.mxu1 %v2605_v3 }
 0x56b   :  { %2104 = vmatpush1.bf16.msra.mxu0 %v2596_v56  ;;  %2136 = vmatpush1.bf16.msra.mxu1 %v2614_v17 }
 0x56c   :  { %2106 = vmatprep.subr.bf16.mxu0 %v2599_v59  ;;  %2138 = vmatprep.subr.bf16.mxu1 %v2622_v21 }
 0x56f   :  { %2108 = vmatpush1.bf16.msra.mxu0 %v2608_v11  ;;  %2140 = vmatpush1.bf16.msra.mxu1 %v2634_v36 }
 0x570   :  { %2110 = vmatprep.subr.bf16.mxu0 %v2611_v13  ;;  %2142 = vmatprep.subr.bf16.mxu1 %v2638_v39 }
 0x573   :  { %2112 = vmatpush1.bf16.msra.mxu0 %v2628_v30  ;;  %2144 = vmatpush1.bf16.msra.mxu1 %v2646_v48 }
 0x574   :  { %2114 = vmatprep.subr.bf16.mxu0 %v2631_v32  ;;  %2146 = vmatprep.subr.bf16.mxu1 %v2650_v51 }
 0x577   :  { %2116 = vmatpush1.bf16.msra.mxu0 %v2642_v45  ;;  %2148 = vmatpush1.bf16.msra.mxu1 %v2660_v57 }
 0x578   :  { %2150 = vmatprep.subr.bf16.mxu0 %v2551_v5  ;;  %2182 = vmatprep.subr.bf16.mxu1 %v2564_v23 }
 0x62d   :  { %v1138_v44 = vpop.f32.mrb[10].mxu0  ;;  %v1209_v50 = vpop.f32.mrb[10].mxu1 }
 0x62e   :  { %v1214_v1 = vadd.f32 %v1138_v44, %v1068_v33  ;;  %v1140_v52 = vpop.f32.mrb[11].mxu0  ;;  %v1211_v54 = vpop.f32.mrb[11].mxu1  ;;  %v1216_v8 = vadd.f32 %v1209_v50, %v1070_v7 }
 0x62f   :  { %v1215_v58 = vadd.f32 %v1140_v52, %v1069_v37  ;;  %v1217_v4 = vadd.f32 %v1211_v54, %v1071_v2  ;;  %v1445_v52 = vld [vmem:[#allocation2 + $0xe8] sm:$0xff] }
 0x630   :  { %v1692_v60 = vmul.f32 -1.442695, %v1214_v1  ;;  %v1444_v1 = vld [vmem:[#allocation2 + $0xe0] sm:$0xff] }
 0x631   :  { %v1693_v62 = vmul.f32 -1.442695, %v1215_v58  ;;  %v1694_v55 = vmul.f32 -1.442695, %v1217_v4 }
 0x632   :  { %2306 = vpow2.f32 %v1692_v60 }
 0x633   :  { %2308 = vpow2.f32 %v1693_v62 }
 0x634   :  { %2310 = vpow2.f32 %v1694_v55 }
 0x635   :  { %2312 = vtanh.f32 %v1216_v8  ;;  %v1447_v8 = vld [vmem:[#allocation2 + $0xf8] sm:$0xff] }
 0x63c   :  { %v2307_v5 = vpop.eup %2306 }
 0x63d   :  { %v2309_v12 = vpop.eup %2308  ;;  %v1221_v23 = vadd.f32 1.0, %v2307_v5 }
 0x63e   :  { %v1227_v16 = vadd.f32 1.0, %v2309_v12  ;;  %v2311_v20 = vpop.eup %2310  ;;  %v1446_v12 = vld [vmem:[#allocation2 + $0xf0] sm:$0xff] }
 0x63f   :  { %2314 = vrcp.f32 %v1221_v23  ;;  %v2313_v22 = vpop.eup %2312  ;;  %v1234_v14 = vadd.f32 1.0, %v2311_v20 }
 0x640   :  { %2316 = vrcp.f32 %v1227_v16 }
 0x641   :  { %2318 = vrcp.f32 %v1234_v14 }
 0x649   :  { %v2315_v61 = vpop.eup %2314 }
 0x64a   :  { %v2317_v6 = vpop.eup %2316  ;;  %v1238_v28 = vmul.f32 %v2315_v61, %v2313_v22 }
 0x64b   :  { %v1237_v24 = vmul.f32 %v2317_v6, %v2886_v40  ;;  %v2319_v41 = vpop.eup %2318 }
 0x64d   :  { %v1239_v25 = vadd.f32 %v1238_v28, %v1237_v24 }
 0x64f   :  { %2320 = vtanh.f32 %v1239_v25  ;;  %v2929_v29 = vsel %vm1248_vm13, %v1239_v25, %v2886_v40 }
 0x659   :  { %v2321_v19 = vpop.eup %2320 }
 0x65a   :  { %v1241_v33 = vmul.f32 %v2321_v19, %v2319_v41  ;;  %v1623_v41 = vpop.permute.xlu1 %1622 }
 0x65b   :  { %vm1624_vm15 = vcmp.eq.s32.totalorder %v1623_v41, 1 }
 0x65c   :  { %v2932_v37 = vsel %vm1248_vm13, %v1241_v33, %v2889_v42  ;;  %v1251_v44 = vsel %vm1248_vm13, %v1241_v33, 0.0 }
 0x65d   :  { %1253 = vst [vmem:[#allocation7 + $0x28] sm:$0xff] %v1251_v44  ;;  %1325 = vmatmul.mubr.f32.vlgmr.msra.gmra.mrb[12].mxu0 %v2932_v37  ;;  %1396 = vmatmul.mubr.f32.vlgmr.msra.gmra.mrb[12].mxu1 %v2932_v37 }
 0x65e   :  { %2152 = vmatpush1.bf16.msra.mxu0 %v2553_v9  ;;  %2184 = vmatpush1.bf16.msra.mxu1 %v2566_v26  ;;  %v1257_v9 = vld [vmem:[#allocation2 + $0xc8] sm:$0xff] }
 0x65f   :  { %2154 = vmatprep.subr.bf16.mxu0 %v2555_v10  ;;  %2186 = vmatprep.subr.bf16.mxu1 %v2576_v34 }
 0x660   :  { %1512 = vmatprep.mubr.f32.mxu0 %v2476_v0  ;;  %1583 = vmatprep.mubr.f32.mxu1 %v2476_v0  ;;  %v1256_v0 = vld [vmem:[#allocation2 + $0xc0] sm:$0xff] }
 0x662   :  { %2156 = vmatpush1.bf16.msra.mxu0 %v2559_v15  ;;  %2188 = vmatpush1.bf16.msra.mxu1 %v2578_v38 }
 0x663   :  { %2158 = vmatprep.subr.bf16.mxu0 %v2562_v18  ;;  %2190 = vmatprep.subr.bf16.mxu1 %v2584_v46 }
 0x666   :  { %2160 = vmatpush1.bf16.msra.mxu0 %v2569_v27  ;;  %2192 = vmatpush1.bf16.msra.mxu1 %v2590_v49 }
 0x667   :  { %2162 = vmatprep.subr.bf16.mxu0 %v2573_v31  ;;  %2194 = vmatprep.subr.bf16.mxu1 %v2593_v53 }
 0x66a   :  { %2164 = vmatpush1.bf16.msra.mxu0 %v2582_v43  ;;  %2196 = vmatpush1.bf16.msra.mxu1 %v2602_v63  ;;  %v1259_v43 = vld [vmem:[#allocation2 + $0xd8] sm:$0xff] }
 0x66b   :  { %2166 = vmatprep.subr.bf16.mxu0 %v2587_v47  ;;  %2198 = vmatprep.subr.bf16.mxu1 %v2605_v3  ;;  %v1258_v47 = vld [vmem:[#allocation2 + $0xd0] sm:$0xff] }
 0x66e   :  { %2168 = vmatpush1.bf16.msra.mxu0 %v2596_v56  ;;  %2200 = vmatpush1.bf16.msra.mxu1 %v2614_v17 }
 0x66f   :  { %2170 = vmatprep.subr.bf16.mxu0 %v2599_v59  ;;  %2202 = vmatprep.subr.bf16.mxu1 %v2622_v21 }
 0x672   :  { %2172 = vmatpush1.bf16.msra.mxu0 %v2608_v11  ;;  %2204 = vmatpush1.bf16.msra.mxu1 %v2634_v36  ;;  %v1435_v36 = vpop.permute.xlu0 %1434 }
 0x673   :  { %2174 = vmatprep.subr.bf16.mxu0 %v2611_v13  ;;  %2206 = vmatprep.subr.bf16.mxu1 %v2638_v39  ;;  %vm1436_vm14 = vcmp.eq.s32.totalorder %v1435_v36, 1 }
 0x676   :  { %2176 = vmatpush1.bf16.msra.mxu0 %v2628_v30  ;;  %2208 = vmatpush1.bf16.msra.mxu1 %v2646_v48 }
 0x677   :  { %2178 = vmatprep.subr.bf16.mxu0 %v2631_v32  ;;  %2210 = vmatprep.subr.bf16.mxu1 %v2650_v51 }
 0x67a   :  { %2180 = vmatpush1.bf16.msra.mxu0 %v2642_v45  ;;  %2212 = vmatpush1.bf16.msra.mxu1 %v2660_v57 }
 0x730   :  { %v1326_v10 = vpop.f32.mrb[12].mxu0  ;;  %v1397_v15 = vpop.f32.mrb[12].mxu1 }
 0x731   :  { %v1402_v18 = vadd.f32 %v1326_v10, %v1256_v0  ;;  %v1328_v26 = vpop.f32.mrb[13].mxu0  ;;  %v1399_v27 = vpop.f32.mrb[13].mxu1  ;;  %v1404_v53 = vadd.f32 %v1397_v15, %v1258_v47 }
 0x732   :  { %v1403_v31 = vadd.f32 %v1328_v26, %v1257_v9  ;;  %v1405_v46 = vadd.f32 %v1399_v27, %v1259_v43 }
 0x733   :  { %v1695_v34 = vmul.f32 -1.442695, %v1402_v18 }
 0x734   :  { %v1696_v38 = vmul.f32 -1.442695, %v1403_v31  ;;  %v1697_v49 = vmul.f32 -1.442695, %v1405_v46 }
 0x735   :  { %2322 = vpow2.f32 %v1695_v34 }
 0x736   :  { %2324 = vpow2.f32 %v1696_v38 }
 0x737   :  { %2326 = vpow2.f32 %v1697_v49 }
 0x738   :  { %2328 = vtanh.f32 %v1404_v53 }
 0x73f   :  { %v2323_v56 = vpop.eup %2322 }
 0x740   :  { %v2325_v59 = vpop.eup %2324  ;;  %v1409_v63 = vadd.f32 1.0, %v2323_v56 }
 0x741   :  { %v1415_v3 = vadd.f32 1.0, %v2325_v59  ;;  %v2327_v11 = vpop.eup %2326 }
 0x742   :  { %2330 = vrcp.f32 %v1409_v63  ;;  %v2329_v13 = vpop.eup %2328  ;;  %v1422_v32 = vadd.f32 1.0, %v2327_v11 }
 0x743   :  { %2332 = vrcp.f32 %v1415_v3 }
 0x744   :  { %2334 = vrcp.f32 %v1422_v32 }
 0x74c   :  { %v2331_v17 = vpop.eup %2330 }
 0x74d   :  { %v2333_v21 = vpop.eup %2332  ;;  %v1426_v30 = vmul.f32 %v2331_v17, %v2329_v13 }
 0x74e   :  { %v1425_v39 = vmul.f32 %v2333_v21, %v2929_v29  ;;  %v2335_v51 = vpop.eup %2334 }
 0x750   :  { %v1427_v45 = vadd.f32 %v1426_v30, %v1425_v39 }
 0x752   :  { %2336 = vtanh.f32 %v1427_v45  ;;  %v1438_v48 = vsel %vm1436_vm14, %v1427_v45, %v2929_v29 }
 0x75c   :  { %v2337_v57 = vpop.eup %2336 }
 0x75d   :  { %v1429_v40 = vmul.f32 %v2337_v57, %v2335_v51 }
 0x75f   :  { %v1437_v42 = vsel %vm1436_vm14, %v1429_v40, %v2932_v37  ;;  %v1439_v50 = vsel %vm1436_vm14, %v1429_v40, 0.0 }
 0x760   :  { %1441 = vst [vmem:[#allocation7 + $0x30] sm:$0xff] %v1439_v50  ;;  %1513 = vmatmul.mubr.f32.vlgmr.msra.gmra.mrb[14].mxu0 %v1437_v42  ;;  %1584 = vmatmul.mubr.f32.vlgmr.msra.gmra.mrb[14].mxu1 %v1437_v42 }
 0x833   :  { %v1514_v54 = vpop.f32.mrb[14].mxu0  ;;  %v1585_v58 = vpop.f32.mrb[14].mxu1 }
 0x834   :  { %v1590_v60 = vadd.f32 %v1514_v54, %v1444_v1  ;;  %v1516_v62 = vpop.f32.mrb[15].mxu0  ;;  %v1587_v2 = vpop.f32.mrb[15].mxu1  ;;  %v1592_v16 = vadd.f32 %v1585_v58, %v1446_v12 }
 0x835   :  { %v1591_v4 = vadd.f32 %v1516_v62, %v1445_v52  ;;  %v1593_v5 = vadd.f32 %v1587_v2, %v1447_v8 }
 0x836   :  { %v1698_v7 = vmul.f32 -1.442695, %v1590_v60 }
 0x837   :  { %v1699_v55 = vmul.f32 -1.442695, %v1591_v4  ;;  %v1700_v23 = vmul.f32 -1.442695, %v1593_v5 }
 0x838   :  { %2338 = vpow2.f32 %v1698_v7 }
 0x839   :  { %2340 = vpow2.f32 %v1699_v55 }
 0x83a   :  { %2342 = vpow2.f32 %v1700_v23 }
 0x83b   :  { %2344 = vtanh.f32 %v1592_v16 }
 0x842   :  { %v2339_v20 = vpop.eup %2338 }
 0x843   :  { %v2341_v22 = vpop.eup %2340  ;;  %v1597_v61 = vadd.f32 1.0, %v2339_v20 }
 0x844   :  { %v1603_v6 = vadd.f32 1.0, %v2341_v22  ;;  %v2343_v28 = vpop.eup %2342 }
 0x845   :  { %2346 = vrcp.f32 %v1597_v61  ;;  %v2345_v14 = vpop.eup %2344  ;;  %v1610_v29 = vadd.f32 1.0, %v2343_v28 }
 0x846   :  { %2348 = vrcp.f32 %v1603_v6 }
 0x847   :  { %2350 = vrcp.f32 %v1610_v29 }
 0x84f   :  { %v2347_v24 = vpop.eup %2346 }
 0x850   :  { %v2349_v35 = vpop.eup %2348  ;;  %v1614_v25 = vmul.f32 %v2347_v24, %v2345_v14 }
 0x851   :  { %v1613_v19 = vmul.f32 %v2349_v35, %v1438_v48  ;;  %v2351_v44 = vpop.eup %2350 }
 0x853   :  { %v1615_v33 = vadd.f32 %v1614_v25, %v1613_v19 }
 0x855   :  { %2352 = vtanh.f32 %v1615_v33  ;;  %v1626_v37 = vsel %vm1624_vm15, %v1615_v33, %v1438_v48 }
 0x856   :  { %1631 = vst [vmem:[#allocation10] sm:$0xff] %v1626_v37 }
 0x85f   :  { %v2353_v0 = vpop.eup %2352 }
 0x860   :  { %v1617_v9 = vmul.f32 %v2353_v0, %v2351_v44 }
 0x862   :  { %v1625_v10 = vsel %vm1624_vm15, %v1617_v9, %v1437_v42  ;;  %v1627_v15 = vsel %vm1624_vm15, %v1617_v9, 0.0 }
 0x863   :  { %1629 = vst [vmem:[#allocation7 + $0x38] sm:$0xff] %v1627_v15  ;;  %1630 = vst [vmem:[#allocation8] sm:$0xff] %v1625_v10 }
 0x864   :  { %2409 = shalt.err (!%p2406_p6)
}
 0x865   :  { %s2410_s14 = scalar_lea.hbm %s3030_s6, 128 }
 0x866   :  { %p2411_p7 = scmp.ne.s32.totalorder %s3030_s6, %s2410_s14  ;;  %p2414_p8 = scmp.lt.u32.totalorder %s2410_s14, %s3030_s6 }
 0x868   :  { %p2416_p9 = pnand %p2414_p8, %p2411_p7 }
 0x86a   :  { %2419 = shalt.err (!%p2416_p9)
}
 0x86b   :  { %1653 = dma.vmem_to_hbm [thread:$0]  %s1651_s29, 128, %s3030_s6, [#allocation9]  }
 0x86c   :  { %s2420_s21 = scalar_lea.vmem %s2972_s8, 1024  ;;  %p2425_p11 = scmp.lt.s32.totalorder %s2972_s8, %s2972_s8 }
 0x86d   :  { %p2421_p10 = scmp.ne.s32.totalorder %s2972_s8, %s2420_s21  ;;  %p2426_p12 = scmp.lt.s32.totalorder %s2420_s21, %s2420_s21 }
 0x86f   :  { %p2427_p13 = por %p2426_p12, %p2425_p11 }
 0x871   :  { %p2428_p0 = pnand %p2427_p13, %p2421_p10 }
 0x873   :  { %2431 = shalt.err (!%p2428_p0)
}
 0x874   :  { %s2432_s24 = scalar_lea.hbm %s3029_s5, 1024 }
 0x875   :  { %p2433_p1 = scmp.ne.s32.totalorder %s3029_s5, %s2432_s24  ;;  %p2436_p2 = scmp.lt.u32.totalorder %s2432_s24, %s3029_s5 }
 0x877   :  { %p2438_p3 = pnand %p2436_p2, %p2433_p1 }
 0x879   :  { %2441 = shalt.err (!%p2438_p3)
}
 0x87a   :  { %s2481_s6 = smov 128   ;;  %s2482_s2 = smov 8  }
 0x87b   :  { %1643 = dma.vmem_to_hbm [thread:$0]  %s2972_s8, 1024, %s3029_s5, [#allocation4], %s2481_s6, %s2481_s6, %s2482_s2  }
 0x87c   :  { %s2442_s28 = scalar_lea.vmem %s2976_s10, 128  ;;  %p2447_p5 = scmp.lt.s32.totalorder %s2976_s10, %s2976_s10 }
 0x87d   :  { %p2443_p4 = scmp.ne.s32.totalorder %s2976_s10, %s2442_s28  ;;  %p2448_p6 = scmp.lt.s32.totalorder %s2442_s28, %s2442_s28 }
 0x87f   :  { %p2449_p7 = por %p2448_p6, %p2447_p5 }
 0x881   :  { %p2450_p8 = pnand %p2449_p7, %p2443_p4 }
 0x883   :  { %2453 = shalt.err (!%p2450_p8)
}
 0x884   :  { %s2454_s30 = scalar_lea.hbm %s3031_s7, 128 }
 0x885   :  { %p2455_p9 = scmp.ne.s32.totalorder %s3031_s7, %s2454_s30  ;;  %p2458_p10 = scmp.lt.u32.totalorder %s2454_s30, %s3031_s7 }
 0x887   :  { %p2460_p11 = pnand %p2458_p10, %p2455_p9 }
 0x889   :  { %2463 = shalt.err (!%p2460_p11)
}
 0x88a   :  { %1663 = dma.vmem_to_hbm [thread:$0]  %s2976_s10, 128, %s3031_s7, [#allocation9]  }
 0x88b   :  { %2468 = dma.done.wait [#allocation4], 1024  }
 0x88c   :  { %2469 = vsyncadd [#allocation4], 4294966272 }
 0x88d   :  { %2470 = dma.done.wait [#allocation9], 256  }
 0x88e   :  { %2471 = vsyncadd [#allocation9], 4294967040 }
 0x88f   :  { %1673 = vsyncpa [#allocation3], 1 }
 0x890   :  { %1674 = vsyncpa [#allocation6], 1 }
 0x891   :  { %1675 = vsyncpa [#allocation4], 1 }
 0x892   :  { %1676 = vsyncpa [#allocation9], 1 }

</bundles_post_ra>
